<compile_context>
chip_gen: v6e
topology: v6e:2x2x1
jax: 0.10.0
libtpu: 0.0.40
codegen_flags: <defaults>
</compile_context>

<pallas_src>
import functools

import jax
import jax.numpy as jnp
from jax.experimental import pallas as pl
from jax.experimental.pallas import tpu as pltpu


def _relu_conv1x1_bn_kernel(x_ref, w_ref, gb_ref, o_ref, *, inv_p, eps, sub_chunk):
    # x_ref:  (Cin,  P_pad)   flattened, zero-padded NCHW activations (channel-major slab)
    # w_ref:  (Cblk, Cin)     this grid step's slice of the 1x1-conv weight
    # gb_ref: (Cblk, 2)       column 0 = gamma, column 1 = beta
    # o_ref:  (Cblk, P_pad)
    x = jnp.maximum(x_ref[...], 0.0)                      # ReLU (VPU); lives in VMEM
    c_blk = w_ref.shape[0]
    n_sub = c_blk // sub_chunk

    # Short static loop over Cout sub-chunks: each y chunk stays register-resident
    # through its reductions and the fused normalize, avoiding a full-y spill/reload.
    for c in range(n_sub):
        r0 = c * sub_chunk
        w = w_ref[r0:r0 + sub_chunk, :]                   # (sub, Cin)

        # 1x1 conv == (sub, Cin) @ (Cin, P_pad) matmul on the MXU, f32 accumulation.
        y = jnp.dot(w, x, preferred_element_type=jnp.float32)  # (sub, P_pad)

        # Single-pass per-channel batch statistics (lane-axis reduce -> XLU).
        # Padded columns are exact zeros, so they add nothing to either sum.
        s = jnp.sum(y, axis=-1, keepdims=True)            # (sub, 1)
        sq = jnp.sum(y * y, axis=-1, keepdims=True)       # (sub, 1)
        mean = s * inv_p
        var = sq * inv_p - mean * mean                    # biased variance
        inv = jax.lax.rsqrt(var + eps)

        gamma = gb_ref[r0:r0 + sub_chunk, 0:1]            # (sub, 1)
        beta = gb_ref[r0:r0 + sub_chunk, 1:2]             # (sub, 1)
        scale = gamma * inv
        shift = beta - mean * scale

        # Fused normalize + affine: one multiply-add sweep, lane-dense store.
        o_ref[r0:r0 + sub_chunk, :] = y * scale + shift


@functools.partial(jax.jit, static_argnames=("eps",))
def relu_conv1x1_bn(x_nchw, w, gamma, beta, eps=1e-5):
    """x_nchw: (N, Cin, H, W); w: (Cout, Cin); gamma/beta: (Cout,).  Returns (N, Cout, H, W)."""
    n, cin, h, wd = x_nchw.shape
    cout = w.shape[0]
    p = n * h * wd
    p_pad = max(128, ((p + 127) // 128) * 128)            # lane-dense slab width

    if n == 1:
        # Free re-view: NCHW with N=1 is already channel-major over the spatial slab.
        x_cp = x_nchw.reshape(cin, p)
    else:
        # TODO(synk): for n > 1 this transpose materializes an extra HBM copy; a gridded
        # NCHW BlockSpec walk would avoid it, but the module's n == 1 case never hits this.
        x_cp = jnp.transpose(x_nchw, (1, 0, 2, 3)).reshape(cin, p)

    if p_pad != p:
        # Zero padding is exact for BN stats: ReLU(0)=0 and W @ 0 = 0.
        x_cp = jnp.pad(x_cp, ((0, 0), (0, p_pad - p)))

    gb = jnp.stack([gamma, beta], axis=-1)                # (Cout, 2), one DMA

    # Split Cout across two grid steps (-> two TensorCores on v7x), sub-chunk inside.
    cout_blocks = 2 if (cout % 16 == 0) else 1
    c_blk = cout // cout_blocks
    sub_chunk = c_blk
    for cand in (96, 88, 80, 72, 64, 56, 48, 40, 32, 24, 16, 8):
        if c_blk % cand == 0:
            sub_chunk = cand
            break

    kernel = functools.partial(
        _relu_conv1x1_bn_kernel,
        inv_p=float(1.0 / p),                             # true P, not padded P
        eps=float(eps),
        sub_chunk=sub_chunk,
    )

    out_cp = pl.pallas_call(
        kernel,
        out_shape=jax.ShapeDtypeStruct((cout, p_pad), jnp.float32),
        grid_spec=pltpu.PrefetchScalarGridSpec(
            num_scalar_prefetch=0,
            grid=(cout_blocks,),
            in_specs=[
                pl.BlockSpec((cin, p_pad), lambda i: (0, 0)),   # x slab, resident/broadcast
                pl.BlockSpec((c_blk, cin), lambda i: (i, 0)),   # weight rows for this step
                pl.BlockSpec((c_blk, 2), lambda i: (i, 0)),     # gamma/beta rows
            ],
            out_specs=pl.BlockSpec((c_blk, p_pad), lambda i: (i, 0)),
        ),
        compiler_params=pltpu.CompilerParams(
            dimension_semantics=("parallel",),
        ),
    )(x_cp, w, gb)

    out_cp = out_cp[:, :p]                                # drop lane padding
    if n == 1:
        return out_cp.reshape(1, cout, h, wd)             # free re-view back to NCHW
    return jnp.transpose(out_cp.reshape(cout, n, h, wd), (1, 0, 2, 3))


def _reference(x_nchw, w, gamma, beta, eps=1e-5):
    # Pure-JAX reference mirroring PyTorch training-mode BN semantics (biased variance).
    x = jnp.maximum(x_nchw, 0.0)
    y = jnp.einsum("nchw,oc->nohw", x, w)
    mean = jnp.mean(y, axis=(0, 2, 3), keepdims=True)
    var = jnp.mean((y - mean) ** 2, axis=(0, 2, 3), keepdims=True)
    yhat = (y - mean) / jnp.sqrt(var + eps)
    return yhat * gamma.reshape(1, -1, 1, 1) + beta.reshape(1, -1, 1, 1)


if __name__ == "__main__":
    # Shapes consistent with the source module: x68 is (1, 288, 14, 14).
    N, C, H, W = 1, 288, 14, 14
    key = jax.random.PRNGKey(0)
    kx, kw, kg, kb = jax.random.split(key, 4)

    x = jax.random.normal(kx, (N, C, H, W), dtype=jnp.float32)
    # Conv2d(288, 288, 1x1, bias=False) weight, squeezed from (Cout, Cin, 1, 1) to (Cout, Cin).
    w = jax.random.normal(kw, (C, C), dtype=jnp.float32) * 0.05
    gamma = 1.0 + 0.1 * jax.random.normal(kg, (C,), dtype=jnp.float32)
    beta = 0.1 * jax.random.normal(kb, (C,), dtype=jnp.float32)

    out = jax.block_until_ready(relu_conv1x1_bn(x, w, gamma, beta))
    ref = _reference(x, w, gamma, beta)

    assert out.shape == (N, C, H, W)
    assert jnp.allclose(out, ref, atol=1e-3, rtol=1e-3), float(jnp.max(jnp.abs(out - ref)))

    # TODO(synk): BatchNorm2d running_mean/running_var buffer updates (training-time side
    # effect) are not produced; only the forward output tensor is computed.
    print("KERNEL_OK")
</pallas_src>

<mosaic_0001>
module attributes {stable_mosaic.version = 11 : i64} {
  func.func @_relu_conv1x1_bn_kernel(%arg0: i32, %arg1: memref<288x256xf32, #tpu.memory_space<vmem>>, %arg2: memref<144x288xf32, #tpu.memory_space<vmem>>, %arg3: memref<144x2xf32, #tpu.memory_space<vmem>>, %arg4: memref<144x256xf32, #tpu.memory_space<vmem>>) attributes {dimension_semantics = [#tpu.dimension_semantics<parallel>], iteration_bounds = array<i64: 2>, scalar_prefetch = 0 : i64, scratch_operands = 0 : i64, tpu.core_type = #tpu.core_type<tc>, window_params = [{pipeline_mode = #tpu.pipeline_mode<synchronous>, transform_indices = @transform_0, window_bounds = array<i64: 288, 256>}, {transform_indices = @transform_1, window_bounds = array<i64: 144, 288>}, {transform_indices = @transform_2, window_bounds = array<i64: 144, 2>}, {transform_indices = @transform_3, window_bounds = array<i64: 144, 256>}]} {
    %c0 = arith.constant 0 : index
    %c0_0 = arith.constant 0 : index
    %0 = vector.load %arg1[%c0, %c0_0] : memref<288x256xf32, #tpu.memory_space<vmem>>, vector<288x256xf32>
    %cst = arith.constant 0.000000e+00 : f32
    %1 = vector.broadcast %cst : f32 to vector<288x256xf32>
    %2 = arith.maximumf %0, %1 : vector<288x256xf32>
    %c0_1 = arith.constant 0 : index
    %c0_2 = arith.constant 0 : index
    %3 = vector.load %arg2[%c0_1, %c0_2] : memref<144x288xf32, #tpu.memory_space<vmem>>, vector<72x288xf32>
    %cst_3 = arith.constant dense<0.000000e+00> : vector<72x256xf32>
    %4 = tpu.matmul %3, %2, %cst_3 {dimension_numbers = #tpu.dot_dimension_numbers<[1], [0], [0], [1], [0, 0, 1, 1], [], []>} : vector<72x288xf32>, vector<288x256xf32>, vector<72x256xf32> -> vector<72x256xf32>
    %cst_4 = arith.constant dense<0.000000e+00> : vector<72xf32>
    %5 = vector.multi_reduction <add>, %4, %cst_4 [1] : vector<72x256xf32> to vector<72xf32>
    %6 = vector.shape_cast %5 : vector<72xf32> to vector<72x1xf32>
    %7 = arith.mulf %4, %4 : vector<72x256xf32>
    %cst_5 = arith.constant dense<0.000000e+00> : vector<72xf32>
    %8 = vector.multi_reduction <add>, %7, %cst_5 [1] : vector<72x256xf32> to vector<72xf32>
    %9 = vector.shape_cast %8 : vector<72xf32> to vector<72x1xf32>
    %cst_6 = arith.constant 0.00510204071 : f32
    %10 = vector.broadcast %cst_6 : f32 to vector<72x1xf32>
    %11 = arith.mulf %6, %10 : vector<72x1xf32>
    %cst_7 = arith.constant 0.00510204071 : f32
    %12 = vector.broadcast %cst_7 : f32 to vector<72x1xf32>
    %13 = arith.mulf %9, %12 : vector<72x1xf32>
    %14 = arith.mulf %11, %11 : vector<72x1xf32>
    %15 = arith.subf %13, %14 : vector<72x1xf32>
    %cst_8 = arith.constant 9.99999974E-6 : f32
    %16 = vector.broadcast %cst_8 : f32 to vector<72x1xf32>
    %17 = arith.addf %15, %16 : vector<72x1xf32>
    %18 = math.rsqrt %17 : vector<72x1xf32>
    %c0_9 = arith.constant 0 : index
    %c0_10 = arith.constant 0 : index
    %19 = vector.load %arg3[%c0_9, %c0_10] : memref<144x2xf32, #tpu.memory_space<vmem>>, vector<72x1xf32>
    %c0_11 = arith.constant 0 : index
    %c1 = arith.constant 1 : index
    %20 = vector.load %arg3[%c0_11, %c1] : memref<144x2xf32, #tpu.memory_space<vmem>>, vector<72x1xf32>
    %21 = arith.mulf %19, %18 : vector<72x1xf32>
    %22 = arith.mulf %11, %21 : vector<72x1xf32>
    %23 = arith.subf %20, %22 : vector<72x1xf32>
    %24 = vector.broadcast %21 : vector<72x1xf32> to vector<72x256xf32>
    %25 = arith.mulf %4, %24 : vector<72x256xf32>
    %26 = vector.broadcast %23 : vector<72x1xf32> to vector<72x256xf32>
    %27 = arith.addf %25, %26 : vector<72x256xf32>
    %c0_12 = arith.constant 0 : index
    %c0_13 = arith.constant 0 : index
    %28 = vector.load %arg4[%c0_12, %c0_13] : memref<144x256xf32, #tpu.memory_space<vmem>>, vector<72x256xf32>
    tpu.vector_store %arg4[%c0_12, %c0_13], %27 {strides = array<i32>} : memref<144x256xf32, #tpu.memory_space<vmem>>, vector<72x256xf32>,
    %c72 = arith.constant 72 : index
    %c0_14 = arith.constant 0 : index
    %29 = vector.load %arg2[%c72, %c0_14] : memref<144x288xf32, #tpu.memory_space<vmem>>, vector<72x288xf32>
    %cst_15 = arith.constant dense<0.000000e+00> : vector<72x256xf32>
    %30 = tpu.matmul %29, %2, %cst_15 {dimension_numbers = #tpu.dot_dimension_numbers<[1], [0], [0], [1], [0, 0, 1, 1], [], []>} : vector<72x288xf32>, vector<288x256xf32>, vector<72x256xf32> -> vector<72x256xf32>
    %cst_16 = arith.constant dense<0.000000e+00> : vector<72xf32>
    %31 = vector.multi_reduction <add>, %30, %cst_16 [1] : vector<72x256xf32> to vector<72xf32>
    %32 = vector.shape_cast %31 : vector<72xf32> to vector<72x1xf32>
    %33 = arith.mulf %30, %30 : vector<72x256xf32>
    %cst_17 = arith.constant dense<0.000000e+00> : vector<72xf32>
    %34 = vector.multi_reduction <add>, %33, %cst_17 [1] : vector<72x256xf32> to vector<72xf32>
    %35 = vector.shape_cast %34 : vector<72xf32> to vector<72x1xf32>
    %cst_18 = arith.constant 0.00510204071 : f32
    %36 = vector.broadcast %cst_18 : f32 to vector<72x1xf32>
    %37 = arith.mulf %32, %36 : vector<72x1xf32>
    %cst_19 = arith.constant 0.00510204071 : f32
    %38 = vector.broadcast %cst_19 : f32 to vector<72x1xf32>
    %39 = arith.mulf %35, %38 : vector<72x1xf32>
    %40 = arith.mulf %37, %37 : vector<72x1xf32>
    %41 = arith.subf %39, %40 : vector<72x1xf32>
    %cst_20 = arith.constant 9.99999974E-6 : f32
    %42 = vector.broadcast %cst_20 : f32 to vector<72x1xf32>
    %43 = arith.addf %41, %42 : vector<72x1xf32>
    %44 = math.rsqrt %43 : vector<72x1xf32>
    %c72_21 = arith.constant 72 : index
    %c0_22 = arith.constant 0 : index
    %45 = vector.load %arg3[%c72_21, %c0_22] : memref<144x2xf32, #tpu.memory_space<vmem>>, vector<72x1xf32>
    %c72_23 = arith.constant 72 : index
    %c1_24 = arith.constant 1 : index
    %46 = vector.load %arg3[%c72_23, %c1_24] : memref<144x2xf32, #tpu.memory_space<vmem>>, vector<72x1xf32>
    %47 = arith.mulf %45, %44 : vector<72x1xf32>
    %48 = arith.mulf %37, %47 : vector<72x1xf32>
    %49 = arith.subf %46, %48 : vector<72x1xf32>
    %50 = vector.broadcast %47 : vector<72x1xf32> to vector<72x256xf32>
    %51 = arith.mulf %30, %50 : vector<72x256xf32>
    %52 = vector.broadcast %49 : vector<72x1xf32> to vector<72x256xf32>
    %53 = arith.addf %51, %52 : vector<72x256xf32>
    %c72_25 = arith.constant 72 : index
    %c0_26 = arith.constant 0 : index
    %54 = vector.load %arg4[%c72_25, %c0_26] : memref<144x256xf32, #tpu.memory_space<vmem>>, vector<72x256xf32>
    tpu.vector_store %arg4[%c72_25, %c0_26], %53 {strides = array<i32>} : memref<144x256xf32, #tpu.memory_space<vmem>>, vector<72x256xf32>,
    return
  }
  func.func @transform_0(%arg0: i32) -> (i32, i32) {
    %c0_i32 = arith.constant 0 : i32
    %c0_i32_0 = arith.constant 0 : i32
    %c0_i32_1 = arith.constant 0 : i32
    return %c0_i32, %c0_i32_0 : i32, i32
  }
  func.func @transform_1(%arg0: i32) -> (i32, i32) {
    %c0_i32 = arith.constant 0 : i32
    %c0_i32_0 = arith.constant 0 : i32
    return %arg0, %c0_i32 : i32, i32
  }
  func.func @transform_2(%arg0: i32) -> (i32, i32) {
    %c0_i32 = arith.constant 0 : i32
    %c0_i32_0 = arith.constant 0 : i32
    return %arg0, %c0_i32 : i32, i32
  }
  func.func @transform_3(%arg0: i32) -> (i32, i32) {
    %c0_i32 = arith.constant 0 : i32
    %c0_i32_0 = arith.constant 0 : i32
    return %arg0, %c0_i32 : i32, i32
  }
}

</mosaic_0001>

<bundles_post_ra>
// kernel: relu_conv1x1_bn.1
= control target key start
LH: loop header
LB: loop body
LE: loop exit
PB: predicated region body
PF: predicated region fallthrough
CT: control target
= control target key end

     0   :  { %s1807_s12 = smov 0   ;;  %s2930_s0 = inlined_call_operand.vmem [shape: f32[288,256], index: 0, kind: input, shape index: {}]   ;;  %s2931_s1 = inlined_call_operand.vmem [shape: f32[288,288], index: 1, kind: input, shape index: {}]   ;;  %s2932_s2 = inlined_call_operand.vmem [shape: f32[288,2], index: 2, kind: input, shape index: {}]   ;;  %s2933_s3 = inlined_call_operand.vmem [shape: f32[288,256], index: 3, kind: output, shape index: {}]  }
   0x1 LB: > { %s1684_s13 = sadd.s32 4294967295, %s1781_s12   ;;  %p1688_p0 = scmp.ge.s32.totalorder %s1781_s12, 1  ;;  %s1781_s12 = sphi %s1807_s12, %s13_s12  }
   0x2   : > { %p150_p1 = scmp.lt.s32.totalorder %s1781_s12, 3 }
   0x4   : > { %p151_p2 = pnand %p1688_p0, %p150_p1 }
   0x6   : > { %154 = sbr.rel (%p151_p2) target bundleno = 769 (0x301), region = 32 }
   0xb   : > { %v1818_v0 = vld [vmem:[%s2930_s0 + $0xf8] sm:$0xff]  ;;  %v1826_v2 = vld [vmem:[%s2930_s0 + $0xf0] sm:$0xff]  ;;  %s1828_s20 = smul.u32 18, %s1684_s13  ;;  %v1840_v7 = vld [vmem:[%s2930_s0 + $0xe8] sm:$0xff]  ;;  %v1783_v9 = vmov 0.0   ;;  %vm372_vm0 = vcmask 261120  }
   0xc   : > { %v272_v1 = vld [vmem:[%s2930_s0 + $0x238] sm:$0xff]  ;;  %v304_v3 = vmax.f32 %v1818_v0, 0.0  ;;  %v303_v5 = vmax.f32 %v1826_v2, 0.0  ;;  %v271_v6 = vld [vmem:[%s2930_s0 + $0x230] sm:$0xff]  ;;  %v270_v8 = vld [vmem:[%s2930_s0 + $0x228] sm:$0xff]  ;;  %583 = vmatprep.mubr.f32.mxu1 %v1783_v9  ;;  %v302_v11 = vmax.f32 %v1840_v7, 0.0 }
   0xd   : > { %v1831_v4 = vmax.f32 %v272_v1, 0.0  ;;  %v1846_v10 = vmax.f32 %v271_v6, 0.0  ;;  %v1849_v12 = vmax.f32 %v270_v8, 0.0  ;;  %v1854_v13 = vld [vmem:[%s2930_s0 + $0xe0] sm:$0xff]  ;;  %v1862_v15 = vld [vmem:[%s2930_s0 + $0xd8] sm:$0xff]  ;;  %v1875_v20 = vld [vmem:[%s2930_s0 + $0xd0] sm:$0xff] }
   0xe   : > { %v269_v14 = vld [vmem:[%s2930_s0 + $0x220] sm:$0xff]  ;;  %400 = vmatprep.subr.mxu0 %v304_v3  ;;  %v301_v16 = vmax.f32 %v1854_v13, 0.0  ;;  %v300_v18 = vmax.f32 %v1862_v15, 0.0  ;;  %v268_v19 = vld [vmem:[%s2930_s0 + $0x218] sm:$0xff]  ;;  %v267_v21 = vld [vmem:[%s2930_s0 + $0x210] sm:$0xff]  ;;  %v299_v23 = vmax.f32 %v1875_v20, 0.0 }
   0xf   : > { %543 = vmatprep.subr.mxu1 %v1831_v4  ;;  %v1866_v17 = vmax.f32 %v269_v14, 0.0  ;;  %401 = vmatpush1.msra.mxu0 %v303_v5  ;;  %v1883_v22 = vmax.f32 %v268_v19, 0.0  ;;  %v1886_v24 = vmax.f32 %v267_v21, 0.0  ;;  %v1891_v25 = vld [vmem:[%s2930_s0 + $0xc8] sm:$0xff]  ;;  %v1899_v27 = vld [vmem:[%s2930_s0 + $0xc0] sm:$0xff]  ;;  %v1913_v31 = vld [vmem:[%s2930_s0 + $0xb8] sm:$0xff] }
  0x10   : > { %544 = vmatpush1.msra.mxu1 %v1846_v10  ;;  %v266_v26 = vld [vmem:[%s2930_s0 + $0x208] sm:$0xff]  ;;  %402 = vmatprep.subr.mxu0 %v302_v11  ;;  %v298_v28 = vmax.f32 %v1891_v25, 0.0  ;;  %v265_v30 = vld [vmem:[%s2930_s0 + $0x200] sm:$0xff]  ;;  %v1918_v32 = vld [vmem:[%s2930_s0 + $0xb0] sm:$0xff]  ;;  %v297_v33 = vmax.f32 %v1899_v27, 0.0  ;;  %p182_p3 = scmp.lt.s32.totalorder %s1828_s20, 35 }
  0x11   : > { %545 = vmatprep.subr.mxu1 %v1849_v12  ;;  %v1905_v29 = vmax.f32 %v266_v26, 0.0  ;;  %403 = vmatpush1.msra.mxu0 %v301_v16  ;;  %v1924_v34 = vmax.f32 %v265_v30, 0.0  ;;  %v1930_v35 = vld [vmem:[%s2930_s0 + $0xa8] sm:$0xff]  ;;  %v296_v36 = vmax.f32 %v1913_v31, 0.0  ;;  %v1939_v37 = vld [vmem:[%s2930_s0 + $0xa0] sm:$0xff]  ;;  %v295_v38 = vmax.f32 %v1918_v32, 0.0 }
  0x12   : > { %546 = vmatpush1.msra.mxu1 %v1866_v17  ;;  %404 = vmatprep.subr.mxu0 %v300_v18  ;;  %s2974_s20 = smov (!%p182_p3, %s1828_s20), 35  ;;  %v1951_v39 = vld [vmem:[%s2930_s0 + $0x98] sm:$0xff]  ;;  %v294_v40 = vmax.f32 %v1930_v35, 0.0  ;;  %v1960_v41 = vld [vmem:[%s2930_s0 + $0x90] sm:$0xff]  ;;  %v293_v42 = vmax.f32 %v1939_v37, 0.0  ;;  %v1968_v43 = vld [vmem:[%s2930_s0 + $0x88] sm:$0xff] }
  0x13   : > { %547 = vmatprep.subr.mxu1 %v1883_v22  ;;  %405 = vmatpush1.msra.mxu0 %v299_v23  ;;  %s1722_s7 = smul.u32 24, %s2974_s20  ;;  %v292_v44 = vmax.f32 %v1951_v39, 0.0  ;;  %v1974_v45 = vld [vmem:[%s2930_s0 + $0x80] sm:$0xff]  ;;  %v291_v46 = vmax.f32 %v1960_v41, 0.0  ;;  %v1985_v47 = vld [vmem:[%s2930_s0 + $0x78] sm:$0xff]  ;;  %v290_v49 = vmax.f32 %v1968_v43, 0.0 }
  0x14   : > { %548 = vmatpush1.msra.mxu1 %v1886_v24  ;;  %406 = vmatprep.subr.mxu0 %v298_v28  ;;  %v1992_v50 = vld [vmem:[%s2930_s0 + $0x70] sm:$0xff]  ;;  %v289_v51 = vmax.f32 %v1974_v45, 0.0  ;;  %v1999_v52 = vld [vmem:[%s2930_s0 + $0x68] sm:$0xff]  ;;  %v288_v53 = vmax.f32 %v1985_v47, 0.0  ;;  %v2007_v54 = vld [vmem:[%s2930_s0 + $0x60] sm:$0xff]  ;;  %s1785_s19 = smov 1  }
  0x15   : > { %549 = vmatprep.subr.mxu1 %v1905_v29  ;;  %407 = vmatpush1.msra.mxu0 %v297_v33  ;;  %s1979_s15 = scalar_lea.vmem %s2931_s1, %s1722_s7  ;;  %v287_v55 = vmax.f32 %v1992_v50, 0.0  ;;  %v2015_v56 = vld [vmem:[%s2930_s0 + $0x58] sm:$0xff]  ;;  %v286_v57 = vmax.f32 %v1999_v52, 0.0  ;;  %v2023_v58 = vld [vmem:[%s2930_s0 + $0x50] sm:$0xff]  ;;  %v285_v59 = vmax.f32 %v2007_v54, 0.0  ;;  %v2031_v60 = vld [vmem:[%s2930_s0 + $0x48] sm:$0xff] }
  0x16   : > { %550 = vmatpush1.msra.mxu1 %v1924_v34  ;;  %408 = vmatprep.subr.mxu0 %v296_v36  ;;  %v347_v48 = vld [vmem:[%s1979_s15 + $0x10] sm:$0xff]  ;;  %v284_v61 = vmax.f32 %v2015_v56, 0.0  ;;  %v2039_v62 = vld [vmem:[%s2930_s0 + $0x40] sm:$0xff]  ;;  %v283_v63 = vmax.f32 %v2023_v58, 0.0  ;;  %v2047_v0 = vld [vmem:[%s2930_s0 + $0x38] sm:$0xff]  ;;  %v282_v1 = vmax.f32 %v2031_v60, 0.0 }
  0x17   : > { %1034 = vmatprep.subr.mxu1 %v304_v3  ;;  %409 = vmatpush1.msra.mxu0 %v295_v38  ;;  %v2053_v2 = vld [vmem:[%s2930_s0 + $0x30] sm:$0xff]  ;;  %v281_v3 = vmax.f32 %v2039_v62, 0.0  ;;  %v280_v6 = vmax.f32 %v2047_v0, 0.0  ;;  %v2065_v7 = vld [vmem:[%s2930_s0 + $0x20] sm:$0xff]  ;;  %v2095_v21 = vld [vmem:[%s2930_s0 + $0x1f8] sm:$0xff]  ;;  %s1713_s21 = sshll.u32 %s2974_s20, 4 }
  0x18   : > { %410 = vmatprep.subr.mxu0 %v294_v40  ;;  %1693 = vmatmul.mubr.msk.f32.vlgmr.msra.gmra.mxu1 %vm372_vm0, %v347_v48  ;;  %v279_v8 = vmax.f32 %v2053_v2, 0.0  ;;  %v2077_v14 = vld [vmem:[%s2930_s0 + $0x10] sm:$0xff]  ;;  %v277_v15 = vmax.f32 %v2065_v7, 0.0  ;;  %v2089_v19 = vld [vmem:[%s2930_s0] sm:$0xff]  ;;  %v2107_v27 = vld [vmem:[%s2930_s0 + $0x1e8] sm:$0xff]  ;;  %s2819_s24 = scalar_lea.vmem %s2933_s3, %s1713_s21 }
  0x19   : > { %411 = vmatpush1.msra.mxu0 %v293_v42  ;;  %1035 = vmatpush1.msra.mxu1 %v303_v5  ;;  %v2059_v5 = vld [vmem:[%s2930_s0 + $0x28] sm:$0xff]  ;;  %v275_v20 = vmax.f32 %v2077_v14, 0.0  ;;  %v2101_v25 = vld [vmem:[%s2930_s0 + $0x1f0] sm:$0xff]  ;;  %v273_v26 = vmax.f32 %v2089_v19, 0.0  ;;  %v2113_v30 = vld [vmem:[%s2930_s0 + $0x1e0] sm:$0xff] }
  0x1a   : > { %412 = vmatprep.subr.mxu0 %v292_v44  ;;  %1036 = vmatprep.subr.mxu1 %v302_v11  ;;  %v2071_v11 = vld [vmem:[%s2930_s0 + $0x18] sm:$0xff]  ;;  %v278_v13 = vmax.f32 %v2059_v5, 0.0  ;;  %v335_v31 = vmax.f32 %v2101_v25, 0.0  ;;  %v2125_v35 = vld [vmem:[%s2930_s0 + $0x1d0] sm:$0xff]  ;;  %v2131_v37 = vld [vmem:[%s2930_s0 + $0x1c8] sm:$0xff] }
  0x1b   : > { %413 = vmatpush1.msra.mxu0 %v291_v46  ;;  %1037 = vmatpush1.msra.mxu1 %v301_v16  ;;  %v2083_v16 = vld [vmem:[%s2930_s0 + $0x8] sm:$0xff]  ;;  %v2119_v32 = vld [vmem:[%s2930_s0 + $0x1d8] sm:$0xff]  ;;  %v2137_v39 = vld [vmem:[%s2930_s0 + $0x1c0] sm:$0xff]  ;;  %v330_v41 = vmax.f32 %v2131_v37, 0.0 }
  0x1c   : > { %414 = vmatprep.subr.mxu0 %v290_v49  ;;  %1038 = vmatprep.subr.mxu1 %v300_v18  ;;  %v276_v18 = vmax.f32 %v2071_v11, 0.0  ;;  %v329_v43 = vmax.f32 %v2137_v39, 0.0  ;;  %v2162_v48 = vld [vmem:[%s2930_s0 + $0x1a0] sm:$0xff]  ;;  %v2181_v54 = vld [vmem:[%s2930_s0 + $0x188] sm:$0xff]  ;;  %v2196_v60 = vld [vmem:[%s2930_s0 + $0x178] sm:$0xff] }
  0x1d   : > { %415 = vmatpush1.msra.mxu0 %v289_v51  ;;  %1039 = vmatpush1.msra.mxu1 %v299_v23  ;;  %v274_v23 = vmax.f32 %v2083_v16, 0.0  ;;  %v325_v52 = vmax.f32 %v2162_v48, 0.0  ;;  %v2188_v56 = vld [vmem:[%s2930_s0 + $0x180] sm:$0xff]  ;;  %v2203_v62 = vld [vmem:[%s2930_s0 + $0x170] sm:$0xff]  ;;  %v320_v0 = vmax.f32 %v2196_v60, 0.0  ;;  %v356_v2 = vld [vmem:[%s1979_s15 + $0x58] sm:$0xff] }
  0x1e   : > { %416 = vmatprep.subr.mxu0 %v288_v53  ;;  %1040 = vmatprep.subr.mxu1 %v298_v28  ;;  %v336_v28 = vmax.f32 %v2095_v21, 0.0  ;;  %v242_v11 = vld [vmem:[%s2930_s0 + $0x148] sm:$0xff]  ;;  %v241_v14 = vld [vmem:[%s2930_s0 + $0x140] sm:$0xff]  ;;  %v240_v19 = vld [vmem:[%s2930_s0 + $0x138] sm:$0xff] }
  0x1f   : > { %417 = vmatpush1.msra.mxu0 %v287_v55  ;;  %1041 = vmatpush1.msra.mxu1 %v297_v33  ;;  %v334_v33 = vmax.f32 %v2107_v27, 0.0  ;;  %v239_v21 = vld [vmem:[%s2930_s0 + $0x130] sm:$0xff]  ;;  %v312_v25 = vmax.f32 %v240_v19, 0.0  ;;  %v362_v27 = vld [vmem:[%s1979_s15 + $0x88] sm:$0xff]  ;;  %v233_v37 = vld [vmem:[%s2930_s0 + $0x100] sm:$0xff] }
  0x20   : > { %418 = vmatprep.subr.mxu0 %v286_v57  ;;  %1042 = vmatprep.subr.mxu1 %v296_v36  ;;  %v333_v36 = vmax.f32 %v2113_v30, 0.0  ;;  %v352_v48 = vld [vmem:[%s1979_s15 + $0x38] sm:$0xff]  ;;  %v361_v60 = vld [vmem:[%s1979_s15 + $0x80] sm:$0xff]  ;;  %v994_v19 = vld [vmem:[%s1979_s15 + $0x148] sm:$0xff] }
  0x21   : > { %419 = vmatpush1.msra.mxu0 %v285_v59  ;;  %1043 = vmatpush1.msra.mxu1 %v295_v38  ;;  %v332_v38 = vmax.f32 %v2119_v32, 0.0 }
  0x22   : > { %420 = vmatprep.subr.mxu0 %v284_v61  ;;  %1044 = vmatprep.subr.mxu1 %v294_v40  ;;  %v331_v40 = vmax.f32 %v2125_v35, 0.0  ;;  %v234_v35 = vld [vmem:[%s2930_s0 + $0x108] sm:$0xff] }
  0x23   : > { %421 = vmatpush1.msra.mxu0 %v283_v63  ;;  %1045 = vmatpush1.msra.mxu1 %v293_v42  ;;  %v2144_v42 = vld [vmem:[%s2930_s0 + $0x1b8] sm:$0xff] }
  0x24   : > { %422 = vmatprep.subr.mxu0 %v282_v1  ;;  %1046 = vmatprep.subr.mxu1 %v292_v44  ;;  %v2150_v44 = vld [vmem:[%s2930_s0 + $0x1b0] sm:$0xff]  ;;  %v328_v45 = vmax.f32 %v2144_v42, 0.0  ;;  %v346_v42 = vld [vmem:[%s1979_s15 + $0x8] sm:$0xff] }
  0x25   : > { %423 = vmatpush1.msra.mxu0 %v281_v3  ;;  %1047 = vmatpush1.msra.mxu1 %v291_v46  ;;  %v2156_v46 = vld [vmem:[%s2930_s0 + $0x1a8] sm:$0xff]  ;;  %v327_v47 = vmax.f32 %v2150_v44, 0.0  ;;  %v368_v44 = vld [vmem:[%s1979_s15 + $0xb8] sm:$0xff] }
  0x26   : > { %424 = vmatprep.subr.mxu0 %v280_v6  ;;  %1048 = vmatprep.subr.mxu1 %v290_v49  ;;  %v350_v49 = vld [vmem:[%s1979_s15 + $0x28] sm:$0xff]  ;;  %v326_v50 = vmax.f32 %v2156_v46, 0.0  ;;  %v348_v46 = vld [vmem:[%s1979_s15 + $0x18] sm:$0xff] }
  0x27   : > { %425 = vmatpush1.msra.mxu0 %v279_v8  ;;  %1049 = vmatpush1.msra.mxu1 %v289_v51  ;;  %v2170_v51 = vld [vmem:[%s2930_s0 + $0x198] sm:$0xff] }
  0x28   : > { %426 = vmatprep.subr.mxu0 %v278_v13  ;;  %1050 = vmatprep.subr.mxu1 %v288_v53  ;;  %v2176_v53 = vld [vmem:[%s2930_s0 + $0x190] sm:$0xff] }
  0x29   : > { %427 = vmatpush1.msra.mxu0 %v277_v15  ;;  %1051 = vmatpush1.msra.mxu1 %v287_v55  ;;  %v324_v55 = vmax.f32 %v2170_v51, 0.0  ;;  %v323_v58 = vmax.f32 %v2176_v53, 0.0  ;;  %v980_v51 = vld [vmem:[%s1979_s15 + $0xd8] sm:$0xff] }
  0x2a   : > { %428 = vmatprep.subr.mxu0 %v276_v18  ;;  %1052 = vmatprep.subr.mxu1 %v286_v57  ;;  %v353_v57 = vld [vmem:[%s1979_s15 + $0x40] sm:$0xff]  ;;  %v984_v53 = vld [vmem:[%s1979_s15 + $0xf8] sm:$0xff] }
  0x2b   : > { %429 = vmatpush1.msra.mxu0 %v275_v20  ;;  %1053 = vmatpush1.msra.mxu1 %v285_v59  ;;  %v322_v59 = vmax.f32 %v2181_v54, 0.0  ;;  %v354_v54 = vld [vmem:[%s1979_s15 + $0x48] sm:$0xff] }
  0x2c   : > { %430 = vmatprep.subr.mxu0 %v274_v23  ;;  %1054 = vmatprep.subr.mxu1 %v284_v61  ;;  %v321_v61 = vmax.f32 %v2188_v56, 0.0  ;;  %v358_v56 = vld [vmem:[%s1979_s15 + $0x68] sm:$0xff] }
  0x2d   : > { %431 = vmatpush1.msra.mxu0 %v273_v26  ;;  %1055 = vmatpush1.msra.mxu1 %v283_v63  ;;  %v2209_v63 = vld [vmem:[%s2930_s0 + $0x168] sm:$0xff] }
  0x2e   : > { %432 = vmatprep.subr.mxu0 %v336_v28  ;;  %1056 = vmatprep.subr.mxu1 %v282_v1  ;;  %v2215_v1 = vld [vmem:[%s2930_s0 + $0x160] sm:$0xff]  ;;  %v318_v5 = vmax.f32 %v2209_v63, 0.0 }
  0x2f   : > { %433 = vmatpush2.msra.mxu0 %v335_v31  ;;  %1057 = vmatpush1.msra.mxu1 %v281_v3  ;;  %v319_v3 = vmax.f32 %v2203_v62, 0.0  ;;  %v317_v7 = vmax.f32 %v2215_v1, 0.0  ;;  %v364_v62 = vld [vmem:[%s1979_s15 + $0x98] sm:$0xff]  ;;  %v993_v63 = vld [vmem:[%s1979_s15 + $0x140] sm:$0xff] }
  0x30   : > { %434 = vmatprep.subr.mxu0 %v334_v33  ;;  %1058 = vmatprep.subr.mxu1 %v280_v6  ;;  %v244_v6 = vld [vmem:[%s2930_s0 + $0x158] sm:$0xff] }
  0x31   : > { %435 = vmatpush2.msra.mxu0 %v333_v36  ;;  %1059 = vmatpush1.msra.mxu1 %v279_v8  ;;  %v243_v8 = vld [vmem:[%s2930_s0 + $0x150] sm:$0xff]  ;;  %v996_v1 = vld [vmem:[%s1979_s15 + $0x158] sm:$0xff] }
  0x32   : > { %436 = vmatprep.subr.mxu0 %v332_v38  ;;  %1060 = vmatprep.subr.mxu1 %v278_v13  ;;  %v316_v13 = vmax.f32 %v244_v6, 0.0  ;;  %v315_v16 = vmax.f32 %v243_v8, 0.0  ;;  %v982_v6 = vld [vmem:[%s1979_s15 + $0xe8] sm:$0xff]  ;;  %v1005_v8 = vld [vmem:[%s1979_s15 + $0x1a0] sm:$0xff] }
  0x33   : > { %437 = vmatpush2.msra.mxu0 %v331_v40  ;;  %1061 = vmatpush1.msra.mxu1 %v277_v15  ;;  %v359_v15 = vld [vmem:[%s1979_s15 + $0x70] sm:$0xff] }
  0x34   : > { %438 = vmatprep.subr.mxu0 %v330_v41  ;;  %1062 = vmatprep.subr.mxu1 %v276_v18  ;;  %v314_v18 = vmax.f32 %v242_v11, 0.0  ;;  %v985_v11 = vld [vmem:[%s1979_s15 + $0x100] sm:$0xff] }
  0x35   : > { %439 = vmatpush2.msra.mxu0 %v329_v43  ;;  %1063 = vmatpush1.msra.mxu1 %v275_v20  ;;  %v313_v20 = vmax.f32 %v241_v14, 0.0  ;;  %v988_v14 = vld [vmem:[%s1979_s15 + $0x118] sm:$0xff] }
  0x36   : > { %589 = vmatprep.mubr.f32.mxu1 %v1783_v9  ;;  %1064 = vmatprep.subr.mxu1 %v274_v23  ;;  %v238_v23 = vld [vmem:[%s2930_s0 + $0x128] sm:$0xff] }
  0x37   : > { %440 = vmatprep.subr.mxu0 %v328_v45  ;;  %1065 = vmatpush1.msra.mxu1 %v273_v26  ;;  %v237_v26 = vld [vmem:[%s2930_s0 + $0x120] sm:$0xff]  ;;  %v310_v30 = vmax.f32 %v238_v23, 0.0 }
  0x38   : > { %441 = vmatpush2.msra.mxu0 %v327_v47  ;;  %1694 = vmatmul.mubr.msk.f32.gmra.mxu1 %vm372_vm0, %v350_v49  ;;  %v309_v32 = vmax.f32 %v237_v26, 0.0  ;;  %v981_v49 = vld [vmem:[%s1979_s15 + $0xe0] sm:$0xff] }
  0x39   : > { %1066 = vmatprep.subr.mxu1 %v336_v28  ;;  %442 = vmatprep.subr.mxu0 %v326_v50  ;;  %v311_v28 = vmax.f32 %v239_v21, 0.0  ;;  %v997_v21 = vld [vmem:[%s1979_s15 + $0x160] sm:$0xff] }
  0x3a   : > { %1067 = vmatpush2.msra.mxu1 %v335_v31  ;;  %443 = vmatpush2.msra.mxu0 %v325_v52  ;;  %v236_v31 = vld [vmem:[%s2930_s0 + $0x118] sm:$0xff] }
  0x3b   : > { %1068 = vmatprep.subr.mxu1 %v334_v33  ;;  %595 = vmatprep.mubr.f32.mxu1 %v1783_v9  ;;  %v235_v33 = vld [vmem:[%s2930_s0 + $0x110] sm:$0xff] }
  0x3c   : > { %1069 = vmatpush2.msra.mxu1 %v333_v36  ;;  %444 = vmatprep.subr.mxu0 %v324_v55  ;;  %v308_v36 = vmax.f32 %v236_v31, 0.0  ;;  %v307_v39 = vmax.f32 %v235_v33, 0.0 }
  0x3d   : > { %1695 = vmatmul.mubr.msk.f32.gmra.mxu1 %vm372_vm0, %v353_v57  ;;  %1070 = vmatprep.subr.mxu1 %v332_v38  ;;  %v365_v38 = vld [vmem:[%s1979_s15 + $0xa0] sm:$0xff]  ;;  %v987_v57 = vld [vmem:[%s1979_s15 + $0x110] sm:$0xff] }
  0x3e   : > { %445 = vmatpush2.msra.mxu0 %v323_v58  ;;  %1071 = vmatpush2.msra.mxu1 %v331_v40  ;;  %v306_v40 = vmax.f32 %v234_v35, 0.0 }
  0x3f   : > { %446 = vmatprep.subr.mxu0 %v322_v59  ;;  %1072 = vmatprep.subr.mxu1 %v330_v41  ;;  %v305_v41 = vmax.f32 %v233_v37, 0.0 }
  0x40   : > { %447 = vmatpush2.msra.mxu0 %v321_v61  ;;  %601 = vmatprep.mubr.f32.mxu1 %v1783_v9 }
  0x41   : > { %1073 = vmatpush2.msra.mxu1 %v329_v43  ;;  %448 = vmatprep.subr.mxu0 %v320_v0  ;;  %v345_v43 = vld [vmem:[%s1979_s15] sm:$0xff] }
  0x42   : > { %1696 = vmatmul.mubr.msk.f32.gmra.mxu1 %vm372_vm0, %v356_v2  ;;  %1074 = vmatprep.subr.mxu1 %v328_v45  ;;  %v349_v45 = vld [vmem:[%s1979_s15 + $0x20] sm:$0xff]  ;;  %v370_v2 = vld [vmem:[%s1979_s15 + $0xc8] sm:$0xff] }
  0x43   : > { %449 = vmatpush2.msra.mxu0 %v319_v3  ;;  %1075 = vmatpush2.msra.mxu1 %v327_v47  ;;  %v371_v47 = vld [vmem:[%s1979_s15 + $0xd0] sm:$0xff] }
  0x44   : > { %450 = vmatprep.subr.mxu0 %v318_v5  ;;  %1076 = vmatprep.subr.mxu1 %v326_v50  ;;  %v351_v50 = vld [vmem:[%s1979_s15 + $0x30] sm:$0xff] }
  0x45   : > { %451 = vmatpush2.msra.mxu0 %v317_v7  ;;  %607 = vmatprep.mubr.f32.mxu1 %v1783_v9 }
  0x46   : > { %1077 = vmatpush2.msra.mxu1 %v325_v52  ;;  %452 = vmatprep.subr.mxu0 %v316_v13  ;;  %v355_v52 = vld [vmem:[%s1979_s15 + $0x50] sm:$0xff] }
  0x47   : > { %1697 = vmatmul.mubr.msk.f32.gmra.mxu1 %vm372_vm0, %v359_v15  ;;  %1078 = vmatprep.subr.mxu1 %v324_v55  ;;  %v983_v55 = vld [vmem:[%s1979_s15 + $0xf0] sm:$0xff]  ;;  %v1000_v15 = vld [vmem:[%s1979_s15 + $0x178] sm:$0xff] }
  0x48   : > { %453 = vmatpush2.msra.mxu0 %v315_v16  ;;  %1079 = vmatpush2.msra.mxu1 %v323_v58  ;;  %v357_v58 = vld [vmem:[%s1979_s15 + $0x60] sm:$0xff] }
  0x49   : > { %454 = vmatprep.subr.mxu0 %v314_v18  ;;  %1080 = vmatprep.subr.mxu1 %v322_v59  ;;  %v986_v59 = vld [vmem:[%s1979_s15 + $0x108] sm:$0xff] }
  0x4a   : > { %455 = vmatpush2.msra.mxu0 %v313_v20  ;;  %613 = vmatprep.mubr.f32.mxu1 %v1783_v9 }
  0x4b   : > { %1081 = vmatpush2.msra.mxu1 %v321_v61  ;;  %456 = vmatprep.subr.mxu0 %v312_v25  ;;  %v990_v61 = vld [vmem:[%s1979_s15 + $0x128] sm:$0xff] }
  0x4c   : > { %1698 = vmatmul.mubr.msk.f32.gmra.mxu1 %vm372_vm0, %v362_v27  ;;  %1082 = vmatprep.subr.mxu1 %v320_v0  ;;  %v367_v0 = vld [vmem:[%s1979_s15 + $0xb0] sm:$0xff] }
  0x4d   : > { %457 = vmatpush2.msra.mxu0 %v311_v28  ;;  %1083 = vmatpush2.msra.mxu1 %v319_v3  ;;  %v999_v3 = vld [vmem:[%s1979_s15 + $0x170] sm:$0xff] }
  0x4e   : > { %458 = vmatprep.subr.mxu0 %v310_v30  ;;  %1084 = vmatprep.subr.mxu1 %v318_v5  ;;  %v998_v5 = vld [vmem:[%s1979_s15 + $0x168] sm:$0xff] }
  0x4f   : > { %459 = vmatpush2.msra.mxu0 %v309_v32  ;;  %619 = vmatprep.mubr.f32.mxu1 %v1783_v9 }
  0x50   : > { %1085 = vmatpush2.msra.mxu1 %v317_v7  ;;  %460 = vmatprep.subr.mxu0 %v308_v36  ;;  %v1001_v7 = vld [vmem:[%s1979_s15 + $0x180] sm:$0xff] }
  0x51   : > { %1699 = vmatmul.mubr.msk.f32.gmra.mxu1 %vm372_vm0, %v365_v38  ;;  %1086 = vmatprep.subr.mxu1 %v316_v13  ;;  %v1004_v13 = vld [vmem:[%s1979_s15 + $0x198] sm:$0xff] }
  0x52   : > { %461 = vmatpush2.msra.mxu0 %v307_v39  ;;  %1087 = vmatpush2.msra.mxu1 %v315_v16  ;;  %v991_v16 = vld [vmem:[%s1979_s15 + $0x130] sm:$0xff] }
  0x53   : > { %462 = vmatprep.subr.mxu0 %v306_v40  ;;  %1088 = vmatprep.subr.mxu1 %v314_v18  ;;  %v1003_v18 = vld [vmem:[%s1979_s15 + $0x190] sm:$0xff] }
  0x54   : > { %463 = vmatpush2.msra.mxu0 %v305_v41  ;;  %464 = vmatprep.mubr.f32.mxu0 %v346_v42 }
  0x55   : > { %625 = vmatprep.mubr.f32.mxu1 %v1783_v9  ;;  %1089 = vmatpush2.msra.mxu1 %v313_v20  ;;  %v1006_v20 = vld [vmem:[%s1979_s15 + $0x1a8] sm:$0xff] }
  0x56   : > { %465 = vmatmul.mubr.f32.vlgmr.msra.gmra.mxu0 %v345_v43  ;;  %1700 = vmatmul.mubr.msk.f32.gmra.mxu1 %vm372_vm0, %v368_v44 }
  0x57   : > { %1090 = vmatprep.subr.mxu1 %v312_v25  ;;  %1177 = vmatprep.subr.mxu0 %v1831_v4 }
  0x58   : > { %1091 = vmatpush2.msra.mxu1 %v311_v28  ;;  %1178 = vmatpush1.msra.mxu0 %v1846_v10 }
  0x59   : > { %1092 = vmatprep.subr.mxu1 %v310_v30  ;;  %470 = vmatprep.mubr.f32.mxu0 %v349_v45 }
  0x5a   : > { %631 = vmatprep.mubr.f32.mxu1 %v1783_v9  ;;  %1093 = vmatpush2.msra.mxu1 %v309_v32 }
  0x5b   : > { %471 = vmatmul.mubr.f32.gmra.mxu0 %v348_v46  ;;  %1701 = vmatmul.mubr.msk.f32.gmra.mxu1 %vm372_vm0, %v371_v47 }
  0x5c   : > { %1094 = vmatprep.subr.mxu1 %v308_v36  ;;  %476 = vmatprep.mubr.f32.mxu0 %v352_v48 }
  0x5d   : > { %1095 = vmatpush2.msra.mxu1 %v307_v39  ;;  %1098 = vmatprep.mubr.f32.mxu1 %v981_v49 }
  0x5e   : > { %1096 = vmatprep.subr.mxu1 %v306_v40  ;;  %1179 = vmatprep.subr.mxu0 %v1849_v12 }
  0x5f   : > { %1097 = vmatpush2.msra.mxu1 %v305_v41  ;;  %477 = vmatmul.mubr.f32.gmra.mxu0 %v351_v50 }
  0x60   : > { %1099 = vmatmul.mubr.f32.vlgmr.msra.gmra.mxu1 %v980_v51  ;;  %1180 = vmatpush1.msra.mxu0 %v1866_v17 }
  0x61   : > { %482 = vmatprep.mubr.f32.mxu0 %v355_v52  ;;  %1104 = vmatprep.mubr.f32.mxu1 %v984_v53 }
  0x62   : > { %1714 = vmatprep.subr.mxu1 %v1831_v4  ;;  %1181 = vmatprep.subr.mxu0 %v1883_v22  ;;  %v360_v4 = vld [vmem:[%s1979_s15 + $0x78] sm:$0xff] }
  0x63   : > { %483 = vmatmul.mubr.f32.gmra.mxu0 %v354_v54  ;;  %1718 = vmatpush1.msra.mxu1 %v1846_v10  ;;  %v989_v10 = vld [vmem:[%s1979_s15 + $0x120] sm:$0xff] }
  0x64   : > { %1105 = vmatmul.mubr.f32.gmra.mxu1 %v983_v55  ;;  %488 = vmatprep.mubr.f32.mxu0 %v358_v56 }
  0x65   : > { %1110 = vmatprep.mubr.f32.mxu1 %v987_v57  ;;  %1182 = vmatpush1.msra.mxu0 %v1886_v24 }
  0x66   : > { %1715 = vmatprep.subr.mxu1 %v1849_v12  ;;  %1183 = vmatprep.subr.mxu0 %v1905_v29  ;;  %v363_v12 = vld [vmem:[%s1979_s15 + $0x90] sm:$0xff] }
  0x67   : > { %489 = vmatmul.mubr.f32.gmra.mxu0 %v357_v58  ;;  %1719 = vmatpush1.msra.mxu1 %v1866_v17  ;;  %v992_v17 = vld [vmem:[%s1979_s15 + $0x138] sm:$0xff] }
  0x68   : > { %1111 = vmatmul.mubr.f32.gmra.mxu1 %v986_v59  ;;  %494 = vmatprep.mubr.f32.mxu0 %v361_v60 }
  0x69   : > { %1116 = vmatprep.mubr.f32.mxu1 %v990_v61  ;;  %1184 = vmatpush1.msra.mxu0 %v1924_v34 }
  0x6a   : > { %1716 = vmatprep.subr.mxu1 %v1883_v22  ;;  %v366_v22 = vld [vmem:[%s1979_s15 + $0xa8] sm:$0xff] }
  0x6b   : > { %495 = vmatmul.mubr.f32.gmra.mxu0 %v360_v4  ;;  %1720 = vmatpush1.msra.mxu1 %v1886_v24  ;;  %v995_v24 = vld [vmem:[%s1979_s15 + $0x150] sm:$0xff] }
  0x6c   : > { %1117 = vmatmul.mubr.f32.gmra.mxu1 %v989_v10  ;;  %500 = vmatprep.mubr.f32.mxu0 %v364_v62 }
  0x6d   : > { %1122 = vmatprep.mubr.f32.mxu1 %v993_v63  ;;  %1717 = vmatprep.subr.mxu1 %v1905_v29  ;;  %v369_v29 = vld [vmem:[%s1979_s15 + $0xc0] sm:$0xff] }
  0x6e   : > { %1721 = vmatpush1.msra.mxu1 %v1924_v34  ;;  %v1002_v34 = vld [vmem:[%s1979_s15 + $0x188] sm:$0xff]  ;;  %s1690_s15 = sshll.u32 %s2974_s20, 3 }
  0x6f   : > { %501 = vmatmul.mubr.f32.gmra.mxu0 %v363_v12  ;;  %s2598_s18 = scalar_lea.vmem %s2932_s2, %s1690_s15 }
  0x70   : > { %1123 = vmatmul.mubr.f32.gmra.mxu1 %v992_v17  ;;  %506 = vmatprep.mubr.f32.mxu0 %v367_v0 }
  0x71   : > { %1128 = vmatprep.mubr.f32.mxu1 %v996_v1 }
  0x73   : > { %507 = vmatmul.mubr.f32.gmra.mxu0 %v366_v22 }
  0x74   : > { %1129 = vmatmul.mubr.f32.gmra.mxu1 %v995_v24  ;;  %512 = vmatprep.mubr.f32.mxu0 %v370_v2 }
  0x75   : > { %1134 = vmatprep.mubr.f32.mxu1 %v999_v3 }
  0x77   : > { %513 = vmatmul.mubr.f32.gmra.mxu0 %v369_v29 }
  0x78   : > { %1135 = vmatmul.mubr.f32.gmra.mxu1 %v998_v5  ;;  %1217 = vmatprep.mubr.f32.mxu0 %v1783_v9 }
  0x79   : > { %1140 = vmatprep.mubr.f32.mxu1 %v1002_v34 }
  0x7b   : > { %1702 = vmatmul.mubr.msk.f32.vlgmr.msra.gmra.mxu0 %vm372_vm0, %v982_v6 }
  0x7c   : > { %1141 = vmatmul.mubr.f32.gmra.mxu1 %v1001_v7  ;;  %1223 = vmatprep.mubr.f32.mxu0 %v1783_v9 }
  0x7d   : > { %1146 = vmatprep.mubr.f32.mxu1 %v1005_v8 }
  0x7f   : > { %1703 = vmatmul.mubr.msk.f32.gmra.mxu0 %vm372_vm0, %v985_v11 }
  0x80   : > { %1147 = vmatmul.mubr.f32.gmra.mxu1 %v1004_v13  ;;  %1229 = vmatprep.mubr.f32.mxu0 %v1783_v9 }
  0x81   : > { %1253 = vmatprep.mubr.f32.mxu1 %v1783_v9 }
  0x83   : > { %1704 = vmatmul.mubr.msk.f32.gmra.mxu0 %vm372_vm0, %v988_v14 }
  0x84   : > { %1708 = vmatmul.mubr.msk.f32.vlgmr.msra.gmra.mxu1 %vm372_vm0, %v1000_v15  ;;  %1235 = vmatprep.mubr.f32.mxu0 %v1783_v9 }
  0x85   : > { %1259 = vmatprep.mubr.f32.mxu1 %v1783_v9 }
  0x87   : > { %1705 = vmatmul.mubr.msk.f32.gmra.mxu0 %vm372_vm0, %v991_v16 }
  0x88   : > { %1709 = vmatmul.mubr.msk.f32.gmra.mxu1 %vm372_vm0, %v1003_v18  ;;  %1241 = vmatprep.mubr.f32.mxu0 %v1783_v9 }
  0x89   : > { %1265 = vmatprep.mubr.f32.mxu1 %v1783_v9 }
  0x8b   : > { %1706 = vmatmul.mubr.msk.f32.gmra.mxu0 %vm372_vm0, %v994_v19 }
  0x8c   : > { %1710 = vmatmul.mubr.msk.f32.gmra.mxu1 %vm372_vm0, %v1006_v20  ;;  %1247 = vmatprep.mubr.f32.mxu0 %v1783_v9 }
  0x8f   : > { %1707 = vmatmul.mubr.msk.f32.gmra.mxu0 %vm372_vm0, %v997_v21 }
  0xd8   : > { %v585_v23 = vpop.f32.mrf.mxu1 }
  0xda   : > { %v587_v25 = vpop.f32.mrf.mxu1 }
  0xf8   : > { %v591_v26 = vpop.f32.mrf.mxu1 }
  0xfa   : > { %v593_v27 = vpop.f32.mrf.mxu1 }
  0xfd   : > { %v597_v28 = vpop.f32.mrf.mxu1 }
  0xff   : > { %v599_v30 = vpop.f32.mrf.mxu1 }
 0x102   : > { %v603_v31 = vpop.f32.mrf.mxu1 }
 0x104   : > { %v605_v32 = vpop.f32.mrf.mxu1 }
 0x107   : > { %v609_v33 = vpop.f32.mrf.mxu1 }
 0x109   : > { %v611_v35 = vpop.f32.mrf.mxu1 }
 0x10c   : > { %v615_v36 = vpop.f32.mrf.mxu1 }
 0x10e   : > { %v617_v37 = vpop.f32.mrf.mxu1 }
 0x111   : > { %v2353_v38 = vpop.f32.mrf.mxu1 }
 0x113   : > { %v2355_v39 = vpop.f32.mrf.mxu1 }
 0x116   : > { %v466_v9 = vpop.f32.mrf.mxu0  ;;  %v2359_v41 = vpop.f32.mrf.mxu1 }
 0x117   : > { %v2357_v40 = vadd.f32 %v585_v23, %v466_v9 }
 0x118   : > { %v468_v42 = vpop.f32.mrf.mxu0  ;;  %v2363_v44 = vpop.f32.mrf.mxu1 }
 0x119   : > { %v2361_v43 = vadd.f32 %v587_v25, %v468_v42  ;;  %v665_v47 = vmul.f32 %v2357_v40, %v2357_v40 }
 0x11b   : > { %v472_v45 = vpop.f32.mrf.mxu0  ;;  %v638_v46 = vadd.f32 %v2361_v43, %v2357_v40  ;;  %v666_v48 = vmul.f32 %v2361_v43, %v2361_v43  ;;  %v2371_v49 = vpop.f32.mrf.mxu1 }
 0x11c   : > { %v2373_v52 = vadd.f32 %v591_v26, %v472_v45 }
 0x11d   : > { %v474_v50 = vpop.f32.mrf.mxu0  ;;  %639 = vadd.xlane.f32.xlu0 %v638_v46  ;;  %v683_v51 = vadd.f32 %v666_v48, %v665_v47  ;;  %v2377_v54 = vpop.f32.mrf.mxu1 }
 0x11e   : > { %v2375_v53 = vadd.f32 %v593_v27, %v474_v50  ;;  %v667_v10 = vmul.f32 %v2373_v52, %v2373_v52 }
 0x11f   : > { %v478_v55 = vpop.f32.mrf.mxu0  ;;  %684 = vadd.xlane.f32.xlu1 %v683_v51 }
 0x120   : > { %v2379_v56 = vpop.f32.mrf.mxu1  ;;  %v641_v57 = vadd.f32 %v2375_v53, %v2373_v52  ;;  %v668_v58 = vmul.f32 %v2375_v53, %v2375_v53  ;;  %v2385_v60 = vadd.f32 %v597_v28, %v478_v55 }
 0x121   : > { %v480_v59 = vpop.f32.mrf.mxu0 }
 0x122   : > { %v2387_v61 = vadd.f32 %v599_v30, %v480_v59  ;;  %v2389_v4 = vpop.f32.mrf.mxu1  ;;  %642 = vadd.xlane.f32.xlu0 %v641_v57  ;;  %v686_v17 = vadd.f32 %v668_v58, %v667_v10  ;;  %v669_v3 = vmul.f32 %v2385_v60, %v2385_v60 }
 0x123   : > { %v484_v62 = vpop.f32.mrf.mxu0 }
 0x124   : > { %v2393_v63 = vadd.f32 %v603_v31, %v484_v62  ;;  %v2395_v12 = vpop.f32.mrf.mxu1  ;;  %v644_v0 = vadd.f32 %v2387_v61, %v2385_v60  ;;  %v670_v1 = vmul.f32 %v2387_v61, %v2387_v61 }
 0x125   : > { %v486_v22 = vpop.f32.mrf.mxu0 }
 0x126   : > { %v2401_v24 = vadd.f32 %v605_v32, %v486_v22  ;;  %v2403_v2 = vpop.f32.mrf.mxu1  ;;  %687 = vadd.xlane.f32.xlu0 %v686_v17  ;;  %645 = vadd.xlane.f32.xlu1 %v644_v0  ;;  %v689_v34 = vadd.f32 %v670_v1, %v669_v3  ;;  %v671_v6 = vmul.f32 %v2393_v63, %v2393_v63 }
 0x127   : > { %v490_v29 = vpop.f32.mrf.mxu0 }
 0x128   : > { %v2407_v5 = vpop.f32.mrf.mxu1  ;;  %v672_v7 = vmul.f32 %v2401_v24, %v2401_v24  ;;  %v2413_v11 = vadd.f32 %v609_v33, %v490_v29  ;;  %v647_v20 = vadd.f32 %v2401_v24, %v2393_v63 }
 0x129   : > { %v492_v8 = vpop.f32.mrf.mxu0 }
 0x12a   : > { %v2415_v13 = vadd.f32 %v611_v35, %v492_v8  ;;  %v2417_v14 = vpop.f32.mrf.mxu1  ;;  %690 = vadd.xlane.f32.xlu1 %v689_v34  ;;  %v692_v15 = vadd.f32 %v672_v7, %v671_v6  ;;  %v673_v28 = vmul.f32 %v2413_v11, %v2413_v11 }
 0x12b   : > { %v496_v16 = vpop.f32.mrf.mxu0 }
 0x12c   : > { %v2419_v18 = vadd.f32 %v615_v36, %v496_v16  ;;  %v2421_v19 = vpop.f32.mrf.mxu1  ;;  %693 = vadd.xlane.f32.xlu0 %v692_v15  ;;  %v674_v21 = vmul.f32 %v2415_v13, %v2415_v13  ;;  %v650_v27 = vadd.f32 %v2415_v13, %v2413_v11 }
 0x12d   : > { %v498_v23 = vpop.f32.mrf.mxu0 }
 0x12e   : > { %v2427_v25 = vadd.f32 %v617_v37, %v498_v23  ;;  %v2429_v26 = vpop.f32.mrf.mxu1  ;;  %648 = vadd.xlane.f32.xlu1 %v647_v20  ;;  %v695_v32 = vadd.f32 %v674_v21, %v673_v28  ;;  %v675_v33 = vmul.f32 %v2419_v18, %v2419_v18 }
 0x12f   : > { %v502_v30 = vpop.f32.mrf.mxu0 }
 0x130   : > { %v2435_v31 = vpop.f32.mrf.mxu1  ;;  %651 = vadd.xlane.f32.xlu0 %v650_v27  ;;  %v676_v35 = vmul.f32 %v2427_v25, %v2427_v25  ;;  %v2442_v37 = vadd.f32 %v2353_v38, %v502_v30  ;;  %v653_v50 = vadd.f32 %v2427_v25, %v2419_v18 }
 0x131   : > { %v504_v36 = vpop.f32.mrf.mxu0 }
 0x132   : > { %v2445_v9 = vadd.f32 %v2355_v39, %v504_v36  ;;  %v2447_v42 = vpop.f32.mrf.mxu1  ;;  %696 = vadd.xlane.f32.xlu1 %v695_v32  ;;  %v698_v45 = vadd.f32 %v676_v35, %v675_v33  ;;  %v677_v57 = vmul.f32 %v2442_v37, %v2442_v37 }
 0x133   : > { %v508_v46 = vpop.f32.mrf.mxu0 }
 0x134   : > { %v2450_v47 = vadd.f32 %v2359_v41, %v508_v46  ;;  %v2452_v48 = vpop.f32.mrf.mxu1  ;;  %699 = vadd.xlane.f32.xlu0 %v698_v45  ;;  %v678_v38 = vmul.f32 %v2445_v9, %v2445_v9  ;;  %v656_v41 = vadd.f32 %v2445_v9, %v2442_v37 }
 0x135   : > { %v510_v51 = vpop.f32.mrf.mxu0 }
 0x136   : > { %v2459_v39 = vadd.f32 %v2363_v44, %v510_v51  ;;  %v2461_v55 = vpop.f32.mrf.mxu1  ;;  %654 = vadd.xlane.f32.xlu1 %v653_v50  ;;  %v701_v10 = vadd.f32 %v678_v38, %v677_v57  ;;  %v679_v62 = vmul.f32 %v2450_v47, %v2450_v47 }
 0x137   : > { %v514_v58 = vpop.f32.mrf.mxu0 }
 0x138   : > { %v1136_v59 = vpop.f32.mrf.mxu1  ;;  %657 = vadd.xlane.f32.xlu0 %v656_v41  ;;  %v680_v44 = vmul.f32 %v2459_v39, %v2459_v39  ;;  %v2472_v0 = vadd.f32 %v2371_v49, %v514_v58  ;;  %v659_v7 = vadd.f32 %v2459_v39, %v2450_v47 }
 0x139   : > { %v516_v17 = vpop.f32.mrf.mxu0 }
 0x13a   : > { %v2475_v1 = vadd.f32 %v2377_v54, %v516_v17  ;;  %v1138_v22 = vpop.f32.mrf.mxu1  ;;  %702 = vadd.xlane.f32.xlu1 %v701_v10  ;;  %v704_v3 = vadd.f32 %v680_v44, %v679_v62 }
 0x13b   : > { %v1219_v29 = vpop.f32.mrf.mxu0 }
 0x13c   : > { %v1142_v34 = vpop.f32.mrf.mxu1  ;;  %v2478_v6 = vadd.f32 %v1219_v29, %v2379_v56  ;;  %705 = vadd.xlane.f32.xlu0 %v704_v3  ;;  %v682_v8 = vmul.f32 %v2475_v1, %v2475_v1  ;;  %v662_v16 = vadd.f32 %v2475_v1, %v2472_v0  ;;  %v681_v56 = vmul.f32 %v2472_v0, %v2472_v0 }
 0x13d   : > { %v1221_v49 = vpop.f32.mrf.mxu0 }
 0x13e   : > { %v1144_v15 = vpop.f32.mrf.mxu1  ;;  %v2485_v54 = vadd.f32 %v1221_v49, %v2389_v4  ;;  %660 = vadd.xlane.f32.xlu1 %v659_v7  ;;  %v707_v23 = vadd.f32 %v682_v8, %v681_v56  ;;  %v1299_v27 = vmul.f32 %v2478_v6, %v2478_v6  ;;  %v1784_v4 = vmov 0  }
 0x13f   : > { %v1225_v20 = vpop.f32.mrf.mxu0  ;;  %1735 = vset.pattern.permute.xlu1 %v1784_v4  ;;  %1736 = vset.pattern.permute.xlu0 %v1784_v4 }
 0x140   : > { %v2491_v21 = vpop.f32.mrf.mxu1  ;;  %663 = vadd.xlane.f32.xlu0 %v662_v16  ;;  %v1300_v28 = vmul.f32 %v2485_v54, %v2485_v54  ;;  %v2498_v32 = vadd.f32 %v1225_v20, %v2395_v12  ;;  %v1272_v50 = vadd.f32 %v2485_v54, %v2478_v6 }
 0x141   : > { %v1227_v30 = vpop.f32.mrf.mxu0 }
 0x142   : > { %v1150_v33 = vpop.f32.mrf.mxu1  ;;  %v2501_v35 = vadd.f32 %v1227_v30, %v2403_v2  ;;  %708 = vadd.xlane.f32.xlu1 %v707_v23  ;;  %v1317_v36 = vadd.f32 %v1300_v28, %v1299_v27  ;;  %v1301_v57 = vmul.f32 %v2498_v32, %v2498_v32 }
 0x143   : > { %v1231_v45 = vpop.f32.mrf.mxu0 }
 0x144   : > { %v1255_v46 = vpop.f32.mrf.mxu1  ;;  %1318 = vadd.xlane.f32.xlu0 %v1317_v36  ;;  %v1302_v38 = vmul.f32 %v2501_v35, %v2501_v35  ;;  %v1275_v2 = vadd.f32 %v2501_v35, %v2498_v32  ;;  %v2515_v10 = vadd.f32 %v1231_v45, %v2407_v5 }
 0x145   : > { %v1233_v51 = vpop.f32.mrf.mxu0  ;;  %v2519_v3 = vadd.f32 %v1255_v46, %v1136_v59 }
 0x146   : > { %v2508_v41 = vadd.f32 %v1233_v51, %v2417_v14  ;;  %v1257_v12 = vpop.f32.mrf.mxu1  ;;  %1273 = vadd.xlane.f32.xlu1 %v1272_v50  ;;  %2948 = vst [vmem:[#allocation3_spill] sm:$0xff] %v2515_v10  ;;  %v1320_v17 = vadd.f32 %v1302_v38, %v1301_v57 }
 0x147   : > { %v1237_v58 = vpop.f32.mrf.mxu0  ;;  %v2517_v62 = vadd.f32 %v1257_v12, %v1138_v22  ;;  %2950 = vst [vmem:[#allocation5_spill] sm:$0xff] %v2519_v3  ;;  %v1311_v4 = vmul.f32 %v2519_v3, %v2519_v3 }
 0x148   : > { %2947 = vst [vmem:[#allocation2_spill] sm:$0xff] %v2508_v41  ;;  %v1261_v44 = vpop.f32.mrf.mxu1  ;;  %1276 = vadd.xlane.f32.xlu0 %v1275_v2  ;;  %v2522_v29 = vadd.f32 %v1237_v58, %v2421_v19  ;;  %v1278_v5 = vadd.f32 %v2508_v41, %v2515_v10  ;;  %v1304_v22 = vmul.f32 %v2508_v41, %v2508_v41 }
 0x149   : > { %2949 = vst [vmem:[#allocation4_spill] sm:$0xff] %v2517_v62  ;;  %v1239_v14 = vpop.f32.mrf.mxu0  ;;  %v1290_v59 = vadd.f32 %v2517_v62, %v2519_v3  ;;  %v1303_v19 = vmul.f32 %v2515_v10, %v2515_v10  ;;  %v2539_v20 = vadd.f32 %v1261_v44, %v1142_v34  ;;  %v2719_v10 = vld [vmem:[%s2598_s18 + $0x58] sm:$0xff] }
 0x14a   : > { %v2525_v7 = vadd.f32 %v1239_v14, %v2429_v26  ;;  %v1263_v8 = vpop.f32.mrf.mxu1  ;;  %1321 = vadd.xlane.f32.xlu1 %v1320_v17  ;;  %v1305_v27 = vmul.f32 %v2522_v29, %v2522_v29 }
 0x14b   : > { %v1243_v49 = vpop.f32.mrf.mxu0  ;;  %v2531_v16 = vadd.f32 %v1263_v8, %v1144_v15  ;;  %2953 = vst [vmem:[#allocation8_spill] sm:$0xff] %v2539_v20  ;;  %v1323_v23 = vadd.f32 %v1304_v22, %v1303_v19  ;;  %v1312_v15 = vmul.f32 %v2517_v62, %v2517_v62  ;;  %v1313_v46 = vmul.f32 %v2539_v20, %v2539_v20 }
 0x14c   : > { %2951 = vst [vmem:[#allocation6_spill] sm:$0xff] %v2525_v7  ;;  %1279 = vadd.xlane.f32.xlu0 %v1278_v5  ;;  %v1306_v26 = vmul.f32 %v2525_v7, %v2525_v7  ;;  %v1267_v36 = vpop.f32.mrf.mxu1  ;;  %v2555_v2 = vadd.f32 %v1243_v49, %v2435_v31  ;;  %v1281_v57 = vadd.f32 %v2525_v7, %v2522_v29 }
 0x14d   : > { %2952 = vst [vmem:[#allocation7_spill] sm:$0xff] %v2531_v16  ;;  %v1245_v56 = vpop.f32.mrf.mxu0  ;;  %v1314_v30 = vmul.f32 %v2531_v16, %v2531_v16  ;;  %v1335_v34 = vadd.f32 %v1312_v15, %v1311_v4  ;;  %v2567_v17 = vadd.f32 %v1267_v36, %v2491_v21  ;;  %v1293_v31 = vadd.f32 %v2531_v16, %v2539_v20 }
 0x14e   : > { %1291 = vadd.xlane.f32.xlu1 %v1290_v59  ;;  %v1326_v28 = vadd.f32 %v1306_v26, %v1305_v27  ;;  %v2552_v50 = vadd.f32 %v1245_v56, %v2447_v42  ;;  %v1269_v51 = vpop.f32.mrf.mxu1  ;;  %2955 = vst [vmem:[#allocation10_spill] sm:$0xff] %v2555_v2  ;;  %v1307_v8 = vmul.f32 %v2555_v2, %v2555_v2 }
 0x14f   : > { %v1249_v45 = vpop.f32.mrf.mxu0  ;;  %v1338_v38 = vadd.f32 %v1314_v30, %v1313_v46  ;;  %v2559_v58 = vadd.f32 %v1269_v51, %v1150_v33  ;;  %2958 = vst [vmem:[#allocation13_spill] sm:$0xff] %v2567_v17  ;;  %v1315_v19 = vmul.f32 %v2567_v17, %v2567_v17 }
 0x150   : > { %1324 = vadd.xlane.f32.xlu0 %v1323_v23  ;;  %2954 = vst [vmem:[#allocation9_spill] sm:$0xff] %v2552_v50  ;;  %v1284_v42 = vadd.f32 %v2552_v50, %v2555_v2  ;;  %v2570_v14 = vadd.f32 %v1249_v45, %v2452_v48  ;;  %v1308_v33 = vmul.f32 %v2552_v50, %v2552_v50 }
 0x151   : > { %v1251_v12 = vpop.f32.mrf.mxu0  ;;  %2956 = vst [vmem:[#allocation11_spill] sm:$0xff] %v2559_v58  ;;  %v1316_v59 = vmul.f32 %v2559_v58, %v2559_v58 }
 0x152   : > { %1327 = vadd.xlane.f32.xlu1 %v1326_v28  ;;  %v2562_v44 = vadd.f32 %v1251_v12, %v2461_v55  ;;  %2959 = vst [vmem:[#allocation14_spill] sm:$0xff] %v2570_v14  ;;  %v1296_v55 = vadd.f32 %v2559_v58, %v2567_v17  ;;  %v1329_v48 = vadd.f32 %v1308_v33, %v1307_v8 }
 0x153   : > { %v1309_v5 = vmul.f32 %v2570_v14, %v2570_v14  ;;  %v1341_v26 = vadd.f32 %v1316_v59, %v1315_v19 }
 0x154   : > { %1336 = vadd.xlane.f32.xlu0 %v1335_v34  ;;  %2957 = vst [vmem:[#allocation12_spill] sm:$0xff] %v2562_v44  ;;  %v1310_v21 = vmul.f32 %v2562_v44, %v2562_v44  ;;  %v1287_v49 = vadd.f32 %v2562_v44, %v2570_v14 }
 0x156   : > { %1339 = vadd.xlane.f32.xlu1 %v1338_v38  ;;  %v1332_v22 = vadd.f32 %v1310_v21, %v1309_v5 }
 0x158   : > { %1282 = vadd.xlane.f32.xlu0 %v1281_v57 }
 0x15a   : > { %1285 = vadd.xlane.f32.xlu1 %v1284_v42 }
 0x15c   : > { %1294 = vadd.xlane.f32.xlu0 %v1293_v31 }
 0x15e   : > { %1297 = vadd.xlane.f32.xlu1 %v1296_v55 }
 0x160   : > { %1330 = vadd.xlane.f32.xlu0 %v1329_v48 }
 0x162   : > { %1333 = vadd.xlane.f32.xlu1 %v1332_v22 }
 0x164   : > { %1288 = vadd.xlane.f32.xlu0 %v1287_v49 }
 0x168   : > { %1342 = vadd.xlane.f32.xlu0 %v1341_v26 }
 0x1a6   : > { %v640_v56 = vpop.xlane.xlu0 %639 }
 0x1a7   : > { %v710_v23 = vmul.f32 0.0051020407, %v640_v56  ;;  %v2607_v56 = vld [vmem:[%s2598_s18] sm:$0xff] }
 0x1a8   : > { %v685_v27 = vpop.xlane.xlu1 %684 }
 0x1a9   : > { %v728_v15 = vmul.f32 %v710_v23, %v710_v23  ;;  %v719_v28 = vmul.f32 0.0051020407, %v685_v27 }
 0x1ab   : > { %v737_v4 = vsub.f32 %v719_v28, %v728_v15  ;;  %v643_v30 = vpop.xlane.xlu0 %642 }
 0x1ac   : > { %v711_v36 = vmul.f32 0.0051020407, %v643_v30 }
 0x1ad   : > { %v746_v45 = vadd.f32 1e-05, %v737_v4 }
 0x1ae   : > { %v729_v38 = vmul.f32 %v711_v36, %v711_v36 }
 0x1af   : > { %1739 = vrsqrt.f32 %v746_v45  ;;  %v688_v34 = vpop.xlane.xlu0 %687  ;;  %v646_v46 = vpop.xlane.xlu1 %645 }
 0x1b0   : > { %v720_v51 = vmul.f32 0.0051020407, %v688_v34  ;;  %v2590_v12 = vmul.f32 0.0051020407, %v646_v46 }
 0x1b2   : > { %v738_v57 = vsub.f32 %v720_v51, %v729_v38  ;;  %v730_v33 = vmul.f32 %v2590_v12, %v2590_v12 }
 0x1b3   : > { %v691_v42 = vpop.xlane.xlu1 %690 }
 0x1b4   : > { %v747_v31 = vadd.f32 1e-05, %v738_v57  ;;  %v721_v55 = vmul.f32 0.0051020407, %v691_v42 }
 0x1b5   : > { %v694_v8 = vpop.xlane.xlu0 %693 }
 0x1b6   : > { %1741 = vrsqrt.f32 %v747_v31  ;;  %v739_v21 = vsub.f32 %v721_v55, %v730_v33  ;;  %v722_v59 = vmul.f32 0.0051020407, %v694_v8  ;;  %v2616_v55 = vld [vmem:[%s2598_s18 + $0x8] sm:$0xff] }
 0x1b7   : > { %v649_v48 = vpop.xlane.xlu1 %648 }
 0x1b8   : > { %v748_v5 = vadd.f32 1e-05, %v739_v21  ;;  %v2600_v22 = vmul.f32 0.0051020407, %v649_v48 }
 0x1b9   : > { %v652_v49 = vpop.xlane.xlu0 %651 }
 0x1ba   : > { %1743 = vrsqrt.f32 %v748_v5  ;;  %v731_v19 = vmul.f32 %v2600_v22, %v2600_v22  ;;  %v2604_v26 = vmul.f32 0.0051020407, %v652_v49 }
 0x1bb   : > { %v697_v27 = vpop.xlane.xlu1 %696 }
 0x1bc   : > { %v1740_v15 = vpop.eup %1739  ;;  %v740_v28 = vsub.f32 %v722_v59, %v731_v19  ;;  %v732_v4 = vmul.f32 %v2604_v26, %v2604_v26  ;;  %v723_v30 = vmul.f32 0.0051020407, %v697_v27 }
 0x1bd   : > { %v700_v45 = vpop.xlane.xlu0 %699  ;;  %v773_v34 = vmul.f32 %v1740_v15, %v2607_v56 }
 0x1be   : > { %v749_v46 = vadd.f32 1e-05, %v740_v28  ;;  %v741_v38 = vsub.f32 %v723_v30, %v732_v4  ;;  %v724_v5 = vmul.f32 0.0051020407, %v700_v45 }
 0x1bf   : > { %v655_v51 = vpop.xlane.xlu1 %654  ;;  %838 = vperm.xlu1 %1735, %v773_v34   ;;  %v782_v57 = vmul.f32 %v773_v34, %v710_v23 }
 0x1c0   : > { %v750_v42 = vadd.f32 1e-05, %v741_v38  ;;  %v2612_v31 = vmul.f32 0.0051020407, %v655_v51  ;;  %1745 = vrsqrt.f32 %v749_v46  ;;  %v2626_v46 = vld [vmem:[%s2598_s18 + $0x10] sm:$0xff] }
 0x1c1   : > { %v658_v33 = vpop.xlane.xlu0 %657  ;;  %800 = vrot.lane.b32.xlu0 %v782_v57, %s1785_s19 }
 0x1c2   : > { %1747 = vrsqrt.f32 %v750_v42  ;;  %v733_v8 = vmul.f32 %v2612_v31, %v2612_v31  ;;  %v2620_v21 = vmul.f32 0.0051020407, %v658_v33 }
 0x1c3   : > { %v1742_v48 = vpop.eup %1741  ;;  %v703_v23 = vpop.xlane.xlu1 %702 }
 0x1c4   : > { %v734_v49 = vmul.f32 %v2620_v21, %v2620_v21  ;;  %v725_v59 = vmul.f32 0.0051020407, %v703_v23  ;;  %v774_v19 = vmul.f32 %v1742_v48, %v2616_v55  ;;  %v742_v27 = vsub.f32 %v724_v5, %v733_v8 }
 0x1c5   : > { %v706_v15 = vpop.xlane.xlu0 %705 }
 0x1c6   : > { %v743_v28 = vsub.f32 %v725_v59, %v734_v49  ;;  %843 = vperm.xlu0 %1736, %v774_v19   ;;  %v783_v4 = vmul.f32 %v774_v19, %v711_v36  ;;  %v751_v45 = vadd.f32 1e-05, %v742_v27  ;;  %v726_v8 = vmul.f32 0.0051020407, %v706_v15  ;;  %v2639_v27 = vld [vmem:[%s2598_s18 + $0x18] sm:$0xff] }
 0x1c7   : > { %v1744_v30 = vpop.eup %1743  ;;  %v661_v34 = vpop.xlane.xlu1 %660 }
 0x1c8   : > { %v752_v38 = vadd.f32 1e-05, %v743_v28  ;;  %v2628_v51 = vmul.f32 0.0051020407, %v661_v34  ;;  %802 = vrot.lane.b32.xlu1 %v783_v4, %s1785_s19  ;;  %v775_v36 = vmul.f32 %v1744_v30, %v2626_v46  ;;  %v2643_v34 = vld [vmem:[%s2598_s18 + $0x20] sm:$0xff] }
 0x1c9   : > { %v664_v57 = vpop.xlane.xlu0 %663 }
 0x1ca   : > { %1749 = vrsqrt.f32 %v752_v38  ;;  %v735_v42 = vmul.f32 %v2628_v51, %v2628_v51  ;;  %v2633_v33 = vmul.f32 0.0051020407, %v664_v57  ;;  %v784_v4 = vmul.f32 %v775_v36, %v2590_v12 }
 0x1cb   : > { %v709_v48 = vpop.xlane.xlu1 %708  ;;  %1751 = vrsqrt.f32 %v751_v45 }
 0x1cc   : > { %v736_v5 = vmul.f32 %v2633_v33, %v2633_v33  ;;  %v727_v23 = vmul.f32 0.0051020407, %v709_v48  ;;  %848 = vperm.xlu1 %1735, %v775_v36   ;;  %v744_v49 = vsub.f32 %v726_v8, %v735_v42 }
 0x1cd   : > { %v1319_v59 = vpop.xlane.xlu0 %1318  ;;  %v1746_v19 = vpop.eup %1745 }
 0x1ce   : > { %v745_v28 = vsub.f32 %v727_v23, %v736_v5  ;;  %v776_v48 = vmul.f32 %v1746_v19, %v2639_v27  ;;  %v753_v45 = vadd.f32 1e-05, %v744_v49  ;;  %v1353_v58 = vmul.f32 0.0051020407, %v1319_v59 }
 0x1cf   : > { %v1748_v38 = vpop.eup %1747  ;;  %v1274_v30 = vpop.xlane.xlu1 %1273 }
 0x1d0   : > { %v754_v15 = vadd.f32 1e-05, %v745_v28  ;;  %v2645_v57 = vmul.f32 0.0051020407, %v1274_v30  ;;  %804 = vrot.lane.b32.xlu1 %v784_v4, %s1785_s19  ;;  %v777_v8 = vmul.f32 %v1748_v38, %v2643_v34  ;;  %v785_v4 = vmul.f32 %v776_v48, %v2600_v22 }
 0x1d1   : > { %v1277_v42 = vpop.xlane.xlu0 %1276 }
 0x1d2   : > { %1753 = vrsqrt.f32 %v754_v15  ;;  %v1362_v12 = vmul.f32 %v2645_v57, %v2645_v57  ;;  %v2652_v36 = vmul.f32 0.0051020407, %v1277_v42  ;;  %v786_v23 = vmul.f32 %v777_v8, %v2604_v26  ;;  %v2662_v42 = vld [vmem:[%s2598_s18 + $0x30] sm:$0xff] }
 0x1d3   : > { %v1322_v5 = vpop.xlane.xlu1 %1321  ;;  %1755 = vrsqrt.f32 %v753_v45 }
 0x1d4   : > { %v1371_v28 = vsub.f32 %v1353_v58, %v1362_v12  ;;  %v1363_v19 = vmul.f32 %v2652_v36, %v2652_v36  ;;  %v1354_v49 = vmul.f32 0.0051020407, %v1322_v5  ;;  %853 = vperm.xlu1 %1735, %v776_v48   ;;  %808 = vrot.lane.b32.xlu0 %v786_v23, %s1785_s19  ;;  %v2666_v58 = vld [vmem:[%s2598_s18 + $0x28] sm:$0xff] }
 0x1d5   : > { %v1280_v59 = vpop.xlane.xlu0 %1279 }
 0x1d6   : > { %v1380_v38 = vadd.f32 1e-05, %v1371_v28  ;;  %v1372_v30 = vsub.f32 %v1354_v49, %v1363_v19  ;;  %v2659_v15 = vmul.f32 0.0051020407, %v1280_v59 }
 0x1d7   : > { %v1750_v26 = vpop.eup %1749  ;;  %v1292_v17 = vpop.xlane.xlu1 %1291 }
 0x1d8   : > { %806 = vrot.lane.b32.xlu1 %v785_v4, %s1785_s19  ;;  %1757 = vrsqrt.f32 %v1380_v38  ;;  %v779_v45 = vmul.f32 %v1750_v26, %v2662_v42  ;;  %v1752_v5 = vpop.eup %1751  ;;  %v1381_v23 = vadd.f32 1e-05, %v1372_v30  ;;  %v1364_v22 = vmul.f32 %v2659_v15, %v2659_v15 }
 0x1d9   : > { %v1325_v12 = vpop.xlane.xlu0 %1324  ;;  %v2671_v48 = vmul.f32 0.0051020407, %v1292_v17  ;;  %v778_v4 = vmul.f32 %v1752_v5, %v2666_v58  ;;  %v2679_v17 = vld [vmem:[%s2598_s18 + $0x40] sm:$0xff] }
 0x1da   : > { %v1355_v28 = vmul.f32 0.0051020407, %v1325_v12  ;;  %v788_v49 = vmul.f32 %v779_v45, %v2620_v21  ;;  %1759 = vrsqrt.f32 %v1381_v23 }
 0x1db   : > { %v1328_v19 = vpop.xlane.xlu1 %1327  ;;  %v1368_v30 = vmul.f32 %v2671_v48, %v2671_v48 }
 0x1dc   : > { %v1373_v59 = vsub.f32 %v1355_v28, %v1364_v22  ;;  %858 = vperm.xlu1 %1735, %v777_v8   ;;  %812 = vrot.lane.b32.xlu0 %v788_v49, %s1785_s19  ;;  %v787_v22 = vmul.f32 %v778_v4, %v2612_v31  ;;  %v2686_v28 = vld [vmem:[%s2598_s18 + $0x38] sm:$0xff] }
 0x1dd   : > { %v1337_v38 = vpop.xlane.xlu0 %1336 }
 0x1de   : > { %v1382_v26 = vadd.f32 1e-05, %v1373_v59  ;;  %v1359_v16 = vmul.f32 0.0051020407, %v1337_v38 }
 0x1df   : > { %v1754_v12 = vpop.eup %1753  ;;  %v1340_v20 = vpop.xlane.xlu1 %1339 }
 0x1e0   : > { %v1377_v50 = vsub.f32 %v1359_v16, %v1368_v30  ;;  %863 = vperm.xlu1 %1735, %v778_v4   ;;  %v2682_v8 = vmul.f32 %v1754_v12, %v2679_v17  ;;  %v1756_v5 = vpop.eup %1755  ;;  %1761 = vrsqrt.f32 %v1382_v26  ;;  %v1356_v16 = vmul.f32 0.0051020407, %v1328_v19 }
 0x1e1   : > { %v1283_v21 = vpop.xlane.xlu0 %1282  ;;  %v2696_v12 = vmul.f32 %v1756_v5, %v2686_v28 }
 0x1e2   : > { %v1386_v23 = vadd.f32 1e-05, %v1377_v50  ;;  %v2688_v49 = vmul.f32 0.0051020407, %v1283_v21  ;;  %v790_v38 = vmul.f32 %v2682_v8, %v2633_v33  ;;  %v2702_v33 = vld [vmem:[%s2598_s18 + $0x48] sm:$0xff] }
 0x1e3   : > { %v1286_v59 = vpop.xlane.xlu1 %1285 }
 0x1e4   : > { %v1365_v30 = vmul.f32 %v2688_v49, %v2688_v49  ;;  %810 = vrot.lane.b32.xlu1 %v787_v22, %s1785_s19  ;;  %816 = vrot.lane.b32.xlu0 %v790_v38, %s1785_s19  ;;  %1763 = vrsqrt.f32 %v1386_v23  ;;  %v1348_v26 = vmul.f32 0.0051020407, %v1286_v59  ;;  %v789_v22 = vmul.f32 %v2696_v12, %v2628_v51 }
 0x1e5   : > { %v1295_v31 = vpop.xlane.xlu0 %1294  ;;  %v1758_v4 = vpop.eup %1757 }
 0x1e6   : > { %v1374_v50 = vsub.f32 %v1356_v16, %v1365_v30  ;;  %v2699_v21 = vmul.f32 0.0051020407, %v1295_v31  ;;  %v2709_v44 = vmul.f32 %v1758_v4, %v2702_v33  ;;  %v1366_v23 = vmul.f32 %v1348_v26, %v1348_v26  ;;  %v2712_v31 = vld [vmem:[%s2598_s18 + $0x50] sm:$0xff] }
 0x1e7   : > { %v1298_v19 = vpop.xlane.xlu1 %1297  ;;  %v1760_v16 = vpop.eup %1759  ;;  %v1360_v30 = vmul.f32 0.0051020407, %v1340_v20 }
 0x1e8   : > { %v1383_v2 = vadd.f32 1e-05, %v1374_v50  ;;  %868 = vperm.xlu1 %1735, %v779_v45   ;;  %v1369_v5 = vmul.f32 %v2699_v21, %v2699_v21  ;;  %v1352_v51 = vmul.f32 0.0051020407, %v1298_v19  ;;  %v1416_v3 = vmul.f32 %v2709_v44, %v2645_v57 }
 0x1e9   : > { %v1331_v38 = vpop.xlane.xlu0 %1330 }
 0x1ea   : > { %1765 = vrsqrt.f32 %v1383_v2  ;;  %v1357_v59 = vmul.f32 0.0051020407, %v1331_v38  ;;  %v1378_v45 = vsub.f32 %v1360_v30, %v1369_v5  ;;  %v1408_v2 = vmul.f32 %v1760_v16, %v2712_v31  ;;  %v2725_v16 = vld [vmem:[%s2598_s18 + $0x78] sm:$0xff] }
 0x1eb   : > { %v1334_v14 = vpop.xlane.xlu1 %1333 }
 0x1ec   : > { %v1375_v50 = vsub.f32 %v1357_v59, %v1366_v23  ;;  %814 = vrot.lane.b32.xlu1 %v789_v22, %s1785_s19  ;;  %v1358_v20 = vmul.f32 0.0051020407, %v1334_v14  ;;  %v1387_v19 = vadd.f32 1e-05, %v1378_v45  ;;  %v1370_v22 = vmul.f32 %v1352_v51, %v1352_v51  ;;  %v2729_v14 = vld [vmem:[%s2598_s18 + $0x60] sm:$0xff] }
 0x1ed   : > { %v1289_v62 = vpop.xlane.xlu0 %1288  ;;  %v1762_v38 = vpop.eup %1761  ;;  %v1417_v57 = vmul.f32 %v1408_v2, %v2652_v36 }
 0x1ee   : > { %v1384_v4 = vadd.f32 1e-05, %v1375_v50  ;;  %v1349_v41 = vmul.f32 0.0051020407, %v1289_v62  ;;  %v1409_v62 = vmul.f32 %v1762_v38, %v2719_v10 }
 0x1f0   : > { %1767 = vrsqrt.f32 %v1384_v4  ;;  %v1367_v23 = vmul.f32 %v1349_v41, %v1349_v41  ;;  %1434 = vrot.lane.b32.xlu1 %v1416_v3, %s1785_s19  ;;  %v1418_v45 = vmul.f32 %v1409_v62, %v2659_v15 }
 0x1f1   : > { %v1343_v5 = vpop.xlane.xlu0 %1342  ;;  %v1764_v50 = vpop.eup %1763  ;;  %1769 = vrsqrt.f32 %v1387_v19  ;;  %v2738_v19 = vld [vmem:[%s2598_s18 + $0x68] sm:$0xff] }
 0x1f2   : > { %v1376_v59 = vsub.f32 %v1358_v20, %v1367_v23  ;;  %v1361_v30 = vmul.f32 0.0051020407, %v1343_v5  ;;  %v1413_v36 = vmul.f32 %v1764_v50, %v2725_v16  ;;  %v2748_v50 = vld [vmem:[%s2598_s18 + $0x80] sm:$0xff] }
 0x1f4   : > { %v1385_v7 = vadd.f32 1e-05, %v1376_v59  ;;  %v1379_v4 = vsub.f32 %v1361_v30, %v1370_v22  ;;  %1436 = vrot.lane.b32.xlu1 %v1417_v57, %s1785_s19  ;;  %v1422_v22 = vmul.f32 %v1413_v36, %v2671_v48  ;;  %v2744_v59 = vld [vmem:[%s2598_s18 + $0x70] sm:$0xff] }
 0x1f6   : > { %1771 = vrsqrt.f32 %v1385_v7  ;;  %v1388_v3 = vadd.f32 1e-05, %v1379_v4 }
 0x1f7   : > { %v1766_v20 = vpop.eup %1765 }
 0x1f8   : > { %v1410_v38 = vmul.f32 %v1766_v20, %v2729_v14  ;;  %1773 = vrsqrt.f32 %v1388_v3  ;;  %1438 = vrot.lane.b32.xlu1 %v1418_v45, %s1785_s19 }
 0x1fa   : > { %v1419_v23 = vmul.f32 %v1410_v38, %v2688_v49  ;;  %v2751_v49 = vld [vmem:[%s2598_s18 + $0x88] sm:$0xff] }
 0x1fc   : > { %1446 = vrot.lane.b32.xlu1 %v1422_v22, %s1785_s19  ;;  %1440 = vrot.lane.b32.xlu0 %v1419_v23, %s1785_s19 }
 0x1fd   : > { %v1768_v7 = vpop.eup %1767 }
 0x1fe   : > { %v1411_v15 = vmul.f32 %v1768_v7, %v2738_v19  ;;  %v1770_v30 = vpop.eup %1769 }
 0x1ff   : > { %v1414_v3 = vmul.f32 %v1770_v30, %v2748_v50 }
 0x200   : > { %v1420_v5 = vmul.f32 %v1411_v15, %v1348_v26 }
 0x201   : > { %v1423_v23 = vmul.f32 %v1414_v3, %v2699_v21 }
 0x202   : > { %1442 = vrot.lane.b32.xlu1 %v1420_v5, %s1785_s19 }
 0x203   : > { %v1772_v57 = vpop.eup %1771 }
 0x204   : > { %v1412_v48 = vmul.f32 %v1772_v57, %v2744_v59 }
 0x205   : > { %v1774_v4 = vpop.eup %1773 }
 0x206   : > { %v1421_v45 = vmul.f32 %v1412_v48, %v1349_v41  ;;  %v1415_v20 = vmul.f32 %v1774_v4, %v2751_v49  ;;  %v1786_v41 = vmov 1  }
 0x208   : > { %1444 = vrot.lane.b32.xlu0 %v1421_v45, %s1785_s19  ;;  %v1424_v26 = vmul.f32 %v1415_v20, %v1352_v51 }
 0x20a   : > { %1450 = vrot.lane.b32.xlu1 %v1424_v26, %s1785_s19 }
 0x20c   : > { %1448 = vrot.lane.b32.xlu0 %v1423_v23, %s1785_s19 }
 0x20e   : > { %878 = vperm.xlu1 %1735, %v2682_v8  }
 0x210   : > { %873 = vperm.xlu0 %1736, %v2696_v12  }
 0x212   : > { %1472 = vperm.xlu1 %1735, %v2709_v44  }
 0x214   : > { %1477 = vperm.xlu0 %1736, %v1408_v2  }
 0x216   : > { %1482 = vperm.xlu1 %1735, %v1409_v62  }
 0x218   : > { %1492 = vperm.xlu0 %1736, %v1411_v15  }
 0x21a   : > { %1487 = vperm.xlu1 %1735, %v1410_v38  }
 0x21c   : > { %1502 = vperm.xlu0 %1736, %v1413_v36  }
 0x21e   : > { %1497 = vperm.xlu1 %1735, %v1412_v48  }
 0x220   : > { %1512 = vperm.xlu0 %1736, %v1415_v20  }
 0x222   : > { %1507 = vperm.xlu1 %1735, %v1414_v3  }
 0x224   : > { %1737 = vset.pattern.permute.xlu0 %v1786_v41 }
 0x226   : > { %1738 = vset.pattern.permute.xlu1 %v1786_v41 }
 0x233   : > { %v801_v21 = vpop.permute.xlu0 %800 }
 0x234   : > { %v827_v51 = vsub.f32 %v2607_v56, %v801_v21 }
 0x236   : > { %901 = vperm.xlu0 %1737, %v827_v51  }
 0x23a   : > { %v2764_v8 = vpop.permute.xlu1 %838 }
 0x23e   : > { %v803_v12 = vpop.permute.xlu1 %802 }
 0x23f   : > { %v828_v44 = vsub.f32 %v2616_v55, %v803_v12 }
 0x241   : > { %906 = vperm.xlu1 %1738, %v828_v44   ;;  %v2767_v2 = vpop.permute.xlu0 %843 }
 0x246   : > { %v809_v22 = vpop.permute.xlu0 %808 }
 0x247   : > { %v2769_v62 = vpop.permute.xlu1 %848  ;;  %v831_v56 = vsub.f32 %v2643_v34, %v809_v22 }
 0x24b   : > { %v805_v36 = vpop.permute.xlu1 %804 }
 0x24c   : > { %v829_v38 = vsub.f32 %v2626_v46, %v805_v36 }
 0x24e   : > { %911 = vperm.xlu1 %1738, %v829_v38   ;;  %v813_v15 = vpop.permute.xlu0 %812 }
 0x24f   : > { %v2772_v7 = vpop.permute.xlu1 %853  ;;  %v833_v30 = vsub.f32 %v2662_v42, %v813_v15 }
 0x252   : > { %921 = vperm.xlu1 %1738, %v831_v56  }
 0x253   : > { %v807_v5 = vpop.permute.xlu1 %806 }
 0x254   : > { %v830_v55 = vsub.f32 %v2639_v27, %v807_v5 }
 0x256   : > { %916 = vperm.xlu0 %1737, %v830_v55   ;;  %931 = vperm.xlu1 %1738, %v833_v30   ;;  %v817_v57 = vpop.permute.xlu0 %816 }
 0x257   : > { %v2777_v48 = vpop.permute.xlu1 %858  ;;  %v835_v46 = vsub.f32 %v2679_v17, %v817_v57  ;;  %v882_v57 = vmul.f32 %v2764_v8, %v2361_v43  ;;  %v883_v43 = vmul.f32 %v2767_v2, %v2373_v52 }
 0x258   : > { %v889_v52 = vmul.f32 %v2777_v48, %v2413_v11 }
 0x25a   : > { %941 = vperm.xlu1 %1738, %v835_v46  }
 0x25b   : > { %v2780_v4 = vpop.permute.xlu1 %863 }
 0x25f   : > { %v811_v3 = vpop.permute.xlu1 %810 }
 0x260   : > { %v832_v34 = vsub.f32 %v2666_v58, %v811_v3 }
 0x262   : > { %926 = vperm.xlu0 %1737, %v832_v34  }
 0x263   : > { %v2783_v45 = vpop.permute.xlu1 %868 }
 0x264   : > { %v893_v11 = vmul.f32 %v2783_v45, %v2442_v37 }
 0x267   : > { %v815_v20 = vpop.permute.xlu1 %814 }
 0x268   : > { %v834_v42 = vsub.f32 %v2686_v28, %v815_v20 }
 0x26a   : > { %936 = vperm.xlu0 %1737, %v834_v42  }
 0x26b   : > { %v1435_v27 = vpop.permute.xlu1 %1434 }
 0x26c   : > { %v1461_v26 = vsub.f32 %v2702_v33, %v1435_v27 }
 0x26e   : > { %1535 = vperm.xlu0 %1737, %v1461_v26   ;;  %v1441_v23 = vpop.permute.xlu0 %1440 }
 0x26f   : > { %v1464_v17 = vsub.f32 %v2729_v14, %v1441_v23  ;;  %v1437_v41 = vpop.permute.xlu1 %1436  ;;  %v885_v23 = vmul.f32 %v2769_v62, %v2385_v60 }
 0x270   : > { %v1462_v21 = vsub.f32 %v2712_v31, %v1437_v41 }
 0x272   : > { %1540 = vperm.xlu1 %1738, %v1462_v21   ;;  %1550 = vperm.xlu0 %1737, %v1464_v17   ;;  %v886_v17 = vmul.f32 %v2769_v62, %v2387_v61  ;;  %v887_v61 = vmul.f32 %v2772_v7, %v2393_v63  ;;  %v888_v62 = vmul.f32 %v2772_v7, %v2401_v24 }
 0x273   : > { %v1439_v58 = vpop.permute.xlu1 %1438 }
 0x274   : > { %v1463_v51 = vsub.f32 %v2719_v10, %v1439_v58 }
 0x276   : > { %1545 = vperm.xlu1 %1738, %v1463_v51  }
 0x277   : > { %v1447_v12 = vpop.permute.xlu1 %1446 }
 0x278   : > { %v1467_v28 = vsub.f32 %v2725_v16, %v1447_v12 }
 0x27a   : > { %1565 = vperm.xlu1 %1738, %v1467_v28   ;;  %v1445_v44 = vpop.permute.xlu0 %1444 }
 0x27b   : > { %v1466_v33 = vsub.f32 %v2744_v59, %v1445_v44  ;;  %v1443_v36 = vpop.permute.xlu1 %1442 }
 0x27c   : > { %v1465_v38 = vsub.f32 %v2738_v19, %v1443_v36 }
 0x27d   : > { %1560 = vperm.xlu0 %1737, %v1466_v33  }
 0x27e   : > { %1555 = vperm.xlu1 %1738, %v1465_v38   ;;  %v1449_v31 = vpop.permute.xlu0 %1448 }
 0x27f   : > { %v1468_v14 = vsub.f32 %v2748_v50, %v1449_v31  ;;  %v1451_v22 = vpop.permute.xlu1 %1450 }
 0x280   : > { %v1469_v10 = vsub.f32 %v2751_v49, %v1451_v22  ;;  %v881_v49 = vmul.f32 %v2764_v8, %v2357_v40  ;;  %v884_v8 = vmul.f32 %v2767_v2, %v2375_v53  ;;  %v890_v53 = vmul.f32 %v2777_v48, %v2415_v13 }
 0x281   : > { %1570 = vperm.xlu0 %1737, %v1468_v14   ;;  %v894_v13 = vmul.f32 %v2783_v45, %v2445_v9  ;;  %v891_v45 = vmul.f32 %v2780_v4, %v2419_v18 }
 0x282   : > { %1575 = vperm.xlu1 %1738, %v1469_v10  }
 0x289   : > { %v879_v16 = vpop.permute.xlu1 %878 }
 0x28a   : > { %v897_v36 = vmul.f32 %v879_v16, %v2472_v0  ;;  %v898_v24 = vmul.f32 %v879_v16, %v2475_v1  ;;  %v892_v0 = vmul.f32 %v2780_v4, %v2427_v25 }
 0x28b   : > { %v2795_v56 = vpop.permute.xlu0 %873 }
 0x28c   : > { %v895_v14 = vmul.f32 %v2795_v56, %v2450_v47  ;;  %v896_v22 = vmul.f32 %v2795_v56, %v2459_v39 }
 0x28d   : > { %v2799_v59 = vpop.permute.xlu1 %1472 }
 0x28e   : > { %v1515_v18 = vmul.f32 %v2799_v59, %v2478_v6  ;;  %v1516_v25 = vmul.f32 %v2799_v59, %v2485_v54 }
 0x28f   : > { %v2797_v15 = vpop.permute.xlu0 %1477 }
 0x290   : > { %v1517_v39 = vmul.f32 %v2797_v15, %v2498_v32  ;;  %v1518_v56 = vmul.f32 %v2797_v15, %v2501_v35  ;;  %v2962_v15 = vld [vmem:[#allocation2_spill] sm:$0xff] }
 0x291   : > { %v2803_v19 = vpop.permute.xlu1 %1482 }
 0x293   : > { %v2801_v5 = vpop.permute.xlu0 %1492 }
 0x295   : > { %v2807_v55 = vpop.permute.xlu1 %1487 }
 0x296   : > { %v1521_v6 = vmul.f32 %v2807_v55, %v2522_v29 }
 0x297   : > { %v2805_v30 = vpop.permute.xlu0 %1502 }
 0x299   : > { %v2821_v3 = vpop.permute.xlu1 %1497 }
 0x29b   : > { %v2809_v50 = vpop.permute.xlu0 %1512 }
 0x29d   : > { %v2825_v40 = vpop.permute.xlu1 %1507 }
 0x2b1   : > { %v902_v46 = vpop.permute.xlu0 %901 }
 0x2b2   : > { %v944_v34 = vadd.f32 %v902_v46, %v881_v49  ;;  %v945_v20 = vadd.f32 %v902_v46, %v882_v57  ;;  %v2960_v46 = vld [vmem:[#allocation6_spill] sm:$0xff] }
 0x2b3   : > { %v1522_v54 = vmul.f32 %v2807_v55, %v2960_v46 }
 0x2b4   : > { %962 = vst [vmem:[%s2819_s24] sm:$0xff] %v944_v34  ;;  %963 = vst [vmem:[%s2819_s24 + $0x8] sm:$0xff] %v945_v20 }
 0x2bc   : > { %v907_v42 = vpop.permute.xlu1 %906 }
 0x2bd   : > { %v946_v27 = vadd.f32 %v907_v42, %v883_v43  ;;  %v947_v26 = vadd.f32 %v907_v42, %v884_v8  ;;  %v2961_v42 = vld [vmem:[#allocation3_spill] sm:$0xff] }
 0x2be   : > { %v1519_v35 = vmul.f32 %v2803_v19, %v2961_v42 }
 0x2bf   : > { %964 = vst [vmem:[%s2819_s24 + $0x10] sm:$0xff] %v946_v27  ;;  %965 = vst [vmem:[%s2819_s24 + $0x18] sm:$0xff] %v947_v26  ;;  %v1520_v27 = vmul.f32 %v2803_v19, %v2962_v15 }
 0x2c9   : > { %v912_v41 = vpop.permute.xlu1 %911 }
 0x2ca   : > { %v948_v21 = vadd.f32 %v912_v41, %v885_v23  ;;  %v949_v58 = vadd.f32 %v912_v41, %v886_v17  ;;  %v2963_v23 = vld [vmem:[#allocation5_spill] sm:$0xff]  ;;  %v2964_v41 = vld [vmem:[#allocation4_spill] sm:$0xff] }
 0x2cb   : > { %v1527_v17 = vmul.f32 %v2805_v30, %v2963_v23 }
 0x2cc   : > { %966 = vst [vmem:[%s2819_s24 + $0x20] sm:$0xff] %v948_v21  ;;  %967 = vst [vmem:[%s2819_s24 + $0x28] sm:$0xff] %v949_v58  ;;  %v1528_v21 = vmul.f32 %v2805_v30, %v2964_v41 }
 0x2cd   : > { %v922_v2 = vpop.permute.xlu1 %921 }
 0x2ce   : > { %v952_v51 = vadd.f32 %v922_v2, %v889_v52  ;;  %v953_v60 = vadd.f32 %v922_v2, %v890_v53  ;;  %v2965_v53 = vld [vmem:[#allocation14_spill] sm:$0xff] }
 0x2cf   : > { %v1525_v2 = vmul.f32 %v2821_v3, %v2965_v53 }
 0x2d0   : > { %970 = vst [vmem:[%s2819_s24 + $0x40] sm:$0xff] %v952_v51  ;;  %971 = vst [vmem:[%s2819_s24 + $0x48] sm:$0xff] %v953_v60  ;;  %v2966_v51 = vld [vmem:[#allocation12_spill] sm:$0xff] }
 0x2d1   : > { %v932_v48 = vpop.permute.xlu1 %931  ;;  %v917_v12 = vpop.permute.xlu0 %916  ;;  %v1526_v60 = vmul.f32 %v2821_v3, %v2966_v51 }
 0x2d2   : > { %v956_v28 = vadd.f32 %v932_v48, %v893_v11  ;;  %v957_v44 = vadd.f32 %v932_v48, %v894_v13  ;;  %v950_v63 = vadd.f32 %v917_v12, %v887_v61  ;;  %v951_v33 = vadd.f32 %v917_v12, %v888_v62  ;;  %v2967_v61 = vld [vmem:[#allocation10_spill] sm:$0xff]  ;;  %v2968_v11 = vld [vmem:[#allocation9_spill] sm:$0xff] }
 0x2d3   : > { %v1523_v62 = vmul.f32 %v2801_v5, %v2967_v61  ;;  %v1524_v30 = vmul.f32 %v2801_v5, %v2968_v11  ;;  %v2971_v5 = vld [vmem:[#allocation13_spill] sm:$0xff] }
 0x2d4   : > { %974 = vst [vmem:[%s2819_s24 + $0x60] sm:$0xff] %v956_v28  ;;  %975 = vst [vmem:[%s2819_s24 + $0x68] sm:$0xff] %v957_v44 }
 0x2d5   : > { %968 = vst [vmem:[%s2819_s24 + $0x30] sm:$0xff] %v950_v63  ;;  %969 = vst [vmem:[%s2819_s24 + $0x38] sm:$0xff] %v951_v33  ;;  %v942_v37 = vpop.permute.xlu1 %941  ;;  %v2969_v33 = vld [vmem:[#allocation8_spill] sm:$0xff] }
 0x2d6   : > { %v960_v9 = vadd.f32 %v942_v37, %v897_v36  ;;  %v961_v7 = vadd.f32 %v942_v37, %v898_v24  ;;  %v1529_v3 = vmul.f32 %v2825_v40, %v2969_v33  ;;  %v2970_v36 = vld [vmem:[#allocation7_spill] sm:$0xff]  ;;  %v1531_v37 = vmul.f32 %v2809_v50, %v2971_v5 }
 0x2d7   : > { %v1530_v24 = vmul.f32 %v2825_v40, %v2970_v36 }
 0x2d8   : > { %978 = vst [vmem:[%s2819_s24 + $0x80] sm:$0xff] %v960_v9  ;;  %979 = vst [vmem:[%s2819_s24 + $0x88] sm:$0xff] %v961_v7  ;;  %v2972_v9 = vld [vmem:[#allocation11_spill] sm:$0xff] }
 0x2d9   : > { %v1532_v7 = vmul.f32 %v2809_v50, %v2972_v9 }
 0x2dd   : > { %v927_v38 = vpop.permute.xlu0 %926 }
 0x2de   : > { %v954_v1 = vadd.f32 %v927_v38, %v891_v45  ;;  %v955_v31 = vadd.f32 %v927_v38, %v892_v0 }
 0x2e0   : > { %972 = vst [vmem:[%s2819_s24 + $0x50] sm:$0xff] %v954_v1  ;;  %973 = vst [vmem:[%s2819_s24 + $0x58] sm:$0xff] %v955_v31 }
 0x2e5   : > { %v937_v10 = vpop.permute.xlu0 %936 }
 0x2e6   : > { %v958_v16 = vadd.f32 %v937_v10, %v895_v14  ;;  %v959_v49 = vadd.f32 %v937_v10, %v896_v22 }
 0x2e8   : > { %976 = vst [vmem:[%s2819_s24 + $0x70] sm:$0xff] %v958_v16  ;;  %977 = vst [vmem:[%s2819_s24 + $0x78] sm:$0xff] %v959_v49 }
 0x2e9   : > { %v1536_v4 = vpop.permute.xlu0 %1535 }
 0x2ea   : > { %v1578_v57 = vadd.f32 %v1536_v4, %v1515_v18  ;;  %v1579_v47 = vadd.f32 %v1536_v4, %v1516_v25 }
 0x2ec   : > { %1596 = vst [vmem:[%s2819_s24 + $0x90] sm:$0xff] %v1578_v57  ;;  %1597 = vst [vmem:[%s2819_s24 + $0x98] sm:$0xff] %v1579_v47 }
 0x2ed   : > { %v1541_v59 = vpop.permute.xlu1 %1540  ;;  %v1551_v34 = vpop.permute.xlu0 %1550 }
 0x2ee   : > { %v1580_v20 = vadd.f32 %v1541_v59, %v1517_v39  ;;  %v1581_v43 = vadd.f32 %v1541_v59, %v1518_v56  ;;  %v1584_v32 = vadd.f32 %v1551_v34, %v1521_v6  ;;  %v1585_v8 = vadd.f32 %v1551_v34, %v1522_v54 }
 0x2f0   : > { %1598 = vst [vmem:[%s2819_s24 + $0xa0] sm:$0xff] %v1580_v20  ;;  %1599 = vst [vmem:[%s2819_s24 + $0xa8] sm:$0xff] %v1581_v43 }
 0x2f1   : > { %1602 = vst [vmem:[%s2819_s24 + $0xc0] sm:$0xff] %v1584_v32  ;;  %1603 = vst [vmem:[%s2819_s24 + $0xc8] sm:$0xff] %v1585_v8  ;;  %v1546_v29 = vpop.permute.xlu1 %1545 }
 0x2f2   : > { %v1582_v55 = vadd.f32 %v1546_v29, %v1519_v35  ;;  %v1583_v26 = vadd.f32 %v1546_v29, %v1520_v27 }
 0x2f4   : > { %1600 = vst [vmem:[%s2819_s24 + $0xb0] sm:$0xff] %v1582_v55  ;;  %1601 = vst [vmem:[%s2819_s24 + $0xb8] sm:$0xff] %v1583_v26 }
 0x2f5   : > { %v1566_v58 = vpop.permute.xlu1 %1565 }
 0x2f6   : > { %v1590_v52 = vadd.f32 %v1566_v58, %v1527_v17  ;;  %v1591_v19 = vadd.f32 %v1566_v58, %v1528_v21 }
 0x2f8   : > { %1608 = vst [vmem:[%s2819_s24 + $0xf0] sm:$0xff] %v1590_v52  ;;  %1609 = vst [vmem:[%s2819_s24 + $0xf8] sm:$0xff] %v1591_v19  ;;  %v1561_v13 = vpop.permute.xlu0 %1560 }
 0x2f9   : > { %v1588_v48 = vadd.f32 %v1561_v13, %v1525_v2  ;;  %v1589_v12 = vadd.f32 %v1561_v13, %v1526_v60  ;;  %v1556_v28 = vpop.permute.xlu1 %1555 }
 0x2fa   : > { %v1586_v44 = vadd.f32 %v1556_v28, %v1523_v62  ;;  %v1587_v63 = vadd.f32 %v1556_v28, %v1524_v30 }
 0x2fb   : > { %1606 = vst [vmem:[%s2819_s24 + $0xe0] sm:$0xff] %v1588_v48  ;;  %1607 = vst [vmem:[%s2819_s24 + $0xe8] sm:$0xff] %v1589_v12 }
 0x2fc   : > { %1604 = vst [vmem:[%s2819_s24 + $0xd0] sm:$0xff] %v1586_v44  ;;  %1605 = vst [vmem:[%s2819_s24 + $0xd8] sm:$0xff] %v1587_v63  ;;  %v1571_v45 = vpop.permute.xlu0 %1570 }
 0x2fd   : > { %v1592_v0 = vadd.f32 %v1571_v45, %v1529_v3  ;;  %v1593_v38 = vadd.f32 %v1571_v45, %v1530_v24  ;;  %v1576_v1 = vpop.permute.xlu1 %1575 }
 0x2fe   : > { %v1594_v31 = vadd.f32 %v1576_v1, %v1531_v37  ;;  %v1595_v14 = vadd.f32 %v1576_v1, %v1532_v7 }
 0x2ff   : > { %1610 = vst [vmem:[%s2819_s24 + $0x100] sm:$0xff] %v1592_v0  ;;  %1611 = vst [vmem:[%s2819_s24 + $0x108] sm:$0xff] %v1593_v38 }
 0x300   : > { %1612 = vst [vmem:[%s2819_s24 + $0x110] sm:$0xff] %v1594_v31  ;;  %1613 = vst [vmem:[%s2819_s24 + $0x118] sm:$0xff] %v1595_v14 }
 0x301 PF: > { %s13_s12 = sadd.s32 1, %s1781_s12  }
 0x302   : > { %p10_p4 = scmp.ge.s32.totalorder %s13_s12, 4  }
 0x304   :  { %12 = sbr.rel (!%p10_p4) target bundleno = 1 (0x1), region = 65 }

</bundles_post_ra>
